<compile_context>
chip_gen: v5e
topology: v5e:2x2
jax: 0.10.0
libtpu: 0.0.40
codegen_flags: <defaults>
</compile_context>

<pallas_src>
import functools
import math

import jax
import jax.numpy as jnp
import numpy as np
from jax.experimental import pallas as pl
from jax.experimental.pallas import tpu as pltpu

SCALE = 4
KERNEL_OPT = dict(nc=8, nf=16, nb=2, ksize=3, spatial=False, mix=False,
                  zero_init=False, head_k=3, body_k=3)
N_QUANT = 5  # Quantization(n=5)


# ----------------------------------------------------------------------------- Pallas kernel
def _fused_deg_kernel(kw_ref, hfr_ref, lf_ref, dht_ref, dww_ref, out_ref, *,
                      channels, scale, ksize, n_quant):
    """One (batch, row-tile) step: blur(hf, kw) + Quantization(bicubic_down(lf))."""
    b = pl.program_id(0)
    s2 = scale * scale
    k2 = ksize * ksize

    # hoisted loads: per-batch kernel weights (SMEM scalars) and downsample matrices
    kws = [kw_ref[b, i] for i in range(k2)]
    dht = dht_ref[...]                       # (th, th*scale)   block-diagonal slice
    dww = dww_ref[...]                       # (W, w)

    for ch in range(channels):
        base = ch * s2

        # ---- blur: ksize^2 scalar-weighted VPU FMAs over dense (th, w) tap slabs -------------
        blur = kws[0] * hfr_ref[0, base, :, :]
        for u in range(ksize):
            for v in range(ksize):
                if u == 0 and v == 0:
                    continue
                blur = blur + kws[u * ksize + v] * hfr_ref[0, base + u * scale + v, :, :]

        # ---- bicubic downsample of lf[ch]: contract H first (lane width = W), then W --------
        t = jnp.dot(dht, lf_ref[0, ch], preferred_element_type=jnp.float32)   # (th, W)
        d = jnp.dot(t, dww, preferred_element_type=jnp.float32)               # (th, w)

        # ---- Quantization(n): q = d + sum_i flag_i/(pi*i*255) * sin(2*pi*i*255*d) -----------
        # angle-addition recurrence: only one sin + one cos hit the EUP.
        theta = (2.0 * math.pi * 255.0) * d
        s1 = jnp.sin(theta)
        c1 = jnp.cos(theta)
        q = d - (1.0 / (math.pi * 255.0)) * s1                                # i = 1 (flag = -1)
        s_i, c_i = s1, c1
        flag = 1.0
        for i in range(2, n_quant + 1):
            s_i, c_i = s_i * c1 + c_i * s1, c_i * c1 - s_i * s1               # sin/cos(i*theta)
            q = q + (flag / (math.pi * float(i) * 255.0)) * s_i
            flag = -flag

        # ---- add + dense rectangular store ---------------------------------------------------
        out_ref[0, ch] = blur + q


# ----------------------------------------------------------------------------- host-side glue
def _bicubic_down_matrix(in_size, scale):
    """(in_size, out_size) matrix reproducing F.interpolate bicubic (align_corners=False)."""
    out_size = in_size // scale
    A = -0.75

    def cub1(x):
        return ((A + 2.0) * x - (A + 3.0)) * x * x + 1.0

    def cub2(x):
        return ((A * x - 5.0 * A) * x + 8.0 * A) * x - 4.0 * A

    D = np.zeros((in_size, out_size), np.float32)
    for i in range(out_size):
        src = (i + 0.5) * scale - 0.5
        fl = int(np.floor(src))
        t = src - fl
        ws = [cub2(t + 1.0), cub1(t), cub1(1.0 - t), cub2(2.0 - t)]
        for tap, wgt in zip([fl - 1, fl, fl + 1, fl + 2], ws):
            tap = min(max(tap, 0), in_size - 1)
            D[tap, i] += wgt
    return jnp.asarray(D)


def _deg_kernel_mlp(zk, params, nb):
    """Non-spatial KernelModel head (1x1 convs on a 1x1 grid == tiny MLP) in plain JAX.

    BN(eval, default running stats) is the identity and is folded away.
    """
    hdn = jnp.maximum(zk @ params["wh"] + params["bh"], 0.0)
    for i in range(nb):
        t = jnp.maximum(hdn @ params["rw1"][i] + params["rb1"][i], 0.0)
        t = t @ params["rw2"][i] + params["rb2"][i]
        hdn = hdn + t
    logits = hdn @ params["wk"] + params["bk"]
    return jax.nn.softmax(logits, axis=-1)


def init_params(key, nc, nf, nb, k2):
    """Deterministic synthetic parameters (BN folded away; eval-mode defaults)."""
    ks = jax.random.split(key, 8)
    s = 0.1
    return dict(
        wh=jax.random.normal(ks[0], (nc, nf), jnp.float32) * s,
        bh=jax.random.normal(ks[1], (1, nf), jnp.float32) * s,
        rw1=jax.random.normal(ks[2], (nb, nf, nf), jnp.float32) * s,
        rb1=jax.random.normal(ks[3], (nb, 1, nf), jnp.float32) * s,
        rw2=jax.random.normal(ks[4], (nb, nf, nf), jnp.float32) * s,
        rb2=jax.random.normal(ks[5], (nb, 1, nf), jnp.float32) * s,
        wk=jax.random.normal(ks[6], (nf, k2), jnp.float32) * s,
        bk=jax.random.normal(ks[7], (1, k2), jnp.float32) * s,
    )


def _pick_row_tile(h, scale):
    """Output-row tile: multiple of 32 so the (th, th*scale) dht block is (8,128)-aligned."""
    if scale != 4:
        return h
    for cand in (64, 32):                    # cap at 64 rows to stay well under v7x VMEM
        if h % cand == 0:
            return cand
    return h


def fre_deg_forward(hf, lf, params, zk, *, scale, ksize, nb):
    B, C, H, W = hf.shape
    assert H % scale == 0 and W % scale == 0
    h, w = H // scale, W // scale
    k2 = ksize * ksize
    pad = ksize // 2
    s2 = scale * scale

    # --- 1) per-batch degradation kernel weights (softmax over ksize^2), tiny MLP in JAX -----
    kw = _deg_kernel_mlp(zk, params, nb)                            # (B, k2)

    # --- 2) host prep for hf: reflect pad + split both spatial dims by `scale` ----------------
    # padded[b, c, i*scale+u, j*scale+v]  ->  hfr[b, c*s2 + u*scale + v, i, j]
    # (blur reads u,v in [0,ksize) only; the scale-pad remainder rows/cols are never read)
    hfp = jnp.pad(hf, ((0, 0), (0, 0), (pad, scale - pad), (pad, scale - pad)), mode="reflect")
    hfr = hfp.reshape(B, C, h + 1, scale, w + 1, scale)[:, :, :h, :, :w, :]
    hfr = jnp.transpose(hfr, (0, 1, 3, 5, 2, 4)).reshape(B, C * s2, h, w)

    # constant bicubic matrices (block diagonal for scale=4 -> row-tileable)
    dht = _bicubic_down_matrix(H, scale).T                          # (h, H)
    dww = _bicubic_down_matrix(W, scale)                            # (W, w)

    th = _pick_row_tile(h, scale)
    n_rt = h // th

    # --- 3) single fused Pallas kernel: blur + bicubic + quantization + add ------------------
    x = pl.pallas_call(
        functools.partial(_fused_deg_kernel, channels=C, scale=scale, ksize=ksize,
                          n_quant=N_QUANT),
        grid=(B, n_rt),
        in_specs=[
            pl.BlockSpec(memory_space=pltpu.MemorySpace.SMEM),                     # kw (B, k2)
            pl.BlockSpec((1, C * s2, th, w), lambda b, r: (b, 0, r, 0)),           # hf taps
            pl.BlockSpec((1, C, th * scale, W), lambda b, r: (b, 0, r, 0)),        # lf rows
            pl.BlockSpec((th, th * scale), lambda b, r: (r, r)),                   # dht block
            pl.BlockSpec((W, w), lambda b, r: (0, 0)),                             # dww
        ],
        out_specs=pl.BlockSpec((1, C, th, w), lambda b, r: (b, 0, r, 0)),
        out_shape=jax.ShapeDtypeStruct((B, C, h, w), jnp.float32),
        compiler_params=pltpu.CompilerParams(
            dimension_semantics=("parallel", "parallel"),
            vmem_limit_bytes=48 * 1024 * 1024),
    )(kw, hfr, lf, dht, dww)

    # matches PyTorch kernel.view(B, ksize, ksize, 1, 1).squeeze()
    kernel = jnp.squeeze(kw.reshape(B, ksize, ksize, 1, 1))
    noise = None                                                    # noise_opt is None
    return x, kernel, noise


# ----------------------------------------------------------------------------- pure-JAX reference
def _reference_forward(hf, lf, kw, *, scale, ksize, n_quant):
    """Independent f32 reference (strided-slice blur taps, constant-tap bicubic, direct sin)."""
    B, C, H, W = hf.shape
    h, w = H // scale, W // scale
    pad = ksize // 2

    hfp = jnp.pad(hf, ((0, 0), (0, 0), (pad, pad), (pad, pad)), mode="reflect")
    blur = jnp.zeros((B, C, h, w), jnp.float32)
    for u in range(ksize):
        for v in range(ksize):
            tap = hfp[:, :, u::scale, v::scale][:, :, :h, :w]
            blur = blur + kw[:, u * ksize + v][:, None, None, None] * tap

    A = -0.75
    def cub1(x): return ((A + 2.0) * x - (A + 3.0)) * x * x + 1.0
    def cub2(x): return ((A * x - 5.0 * A) * x + 8.0 * A) * x - 4.0 * A
    w4 = [cub2(1.5), cub1(0.5), cub1(0.5), cub2(1.5)]               # scale=4: constant taps
    lfv = sum(w4[u] * lf[:, :, u::scale, :] for u in range(scale))  # (B, C, h, W)
    d = sum(w4[v] * lfv[:, :, :, v::scale] for v in range(scale))   # (B, C, h, w)

    out = d * 255.0
    flag = -1.0
    for i in range(1, n_quant + 1):
        out = out + flag / np.pi / i * jnp.sin(2.0 * i * np.pi * d * 255.0)
        flag = -flag
    return blur + out / 255.0


if __name__ == "__main__":
    key = jax.random.PRNGKey(0)
    k_hf, k_lf, k_par, k_zk = jax.random.split(key, 4)

    B, C, H, W = 2, 3, 16, 16
    nc, nf, nb, ksize = (KERNEL_OPT["nc"], KERNEL_OPT["nf"],
                         KERNEL_OPT["nb"], KERNEL_OPT["ksize"])

    hf_inp = jax.random.normal(k_hf, (B, C, H, W), jnp.float32)
    lf_inp = jax.random.normal(k_lf, (B, C, H, W), jnp.float32)
    params = init_params(k_par, nc, nf, nb, ksize * ksize)
    # torch.randn(B, nc, 1, 1) -> represented as (B, nc) since spatial dims are 1x1
    zk = jax.random.normal(k_zk, (B, nc), jnp.float32)

    x, kernel, noise = fre_deg_forward(hf_inp, lf_inp, params, zk,
                                       scale=SCALE, ksize=ksize, nb=nb)
    jax.block_until_ready((x, kernel))

    assert x.shape == (B, C, H // SCALE, W // SCALE)
    assert kernel.shape == (B, ksize, ksize)
    assert noise is None
    assert bool(jnp.all(jnp.isfinite(x))) and bool(jnp.all(jnp.isfinite(kernel)))

    # correctness vs an independent pure-JAX f32 reference.  Tolerance is deliberately loose to
    # absorb MXU f32-emulation + sin-recurrence differences through the steep quantization
    # staircase; genuine tap/index/weight bugs produce O(0.3-1) errors and are still caught.
    kw = _deg_kernel_mlp(zk, params, nb)
    x_ref = _reference_forward(hf_inp, lf_inp, kw, scale=SCALE, ksize=ksize, n_quant=N_QUANT)
    assert bool(jnp.allclose(x, x_ref, rtol=5e-2, atol=5e-2))

    print("KERNEL_OK")
</pallas_src>

<mosaic_0001>
module attributes {stable_mosaic.version = 11 : i64} {
  func.func @_fused_deg_kernel(%arg0: i32, %arg1: i32, %arg2: memref<2x9xf32, #tpu.memory_space<smem>>, %arg3: memref<1x48x4x4xf32, #tpu.memory_space<vmem>>, %arg4: memref<1x3x16x16xf32, #tpu.memory_space<vmem>>, %arg5: memref<4x16xf32, #tpu.memory_space<vmem>>, %arg6: memref<16x4xf32, #tpu.memory_space<vmem>>, %arg7: memref<1x3x4x4xf32, #tpu.memory_space<vmem>>) attributes {dimension_semantics = [#tpu.dimension_semantics<parallel>, #tpu.dimension_semantics<parallel>], iteration_bounds = array<i64: 2, 1>, scalar_prefetch = 0 : i64, scratch_operands = 0 : i64, tpu.core_type = #tpu.core_type<tc>, window_params = [{transform_indices = @transform_0, window_bounds = array<i64: 2, 9>}, {transform_indices = @transform_1, window_bounds = array<i64: 1, 48, 4, 4>}, {transform_indices = @transform_2, window_bounds = array<i64: 1, 3, 16, 16>}, {transform_indices = @transform_3, window_bounds = array<i64: 4, 16>}, {pipeline_mode = #tpu.pipeline_mode<synchronous>, transform_indices = @transform_4, window_bounds = array<i64: 16, 4>}, {transform_indices = @transform_5, window_bounds = array<i64: 1, 3, 4, 4>}]} {
    %0 = arith.index_cast %arg0 : i32 to index
    %c0 = arith.constant 0 : index
    %1 = memref.load %arg2[%0, %c0] : memref<2x9xf32, #tpu.memory_space<smem>>
    %2 = arith.index_cast %arg0 : i32 to index
    %c1 = arith.constant 1 : index
    %3 = memref.load %arg2[%2, %c1] : memref<2x9xf32, #tpu.memory_space<smem>>
    %4 = arith.index_cast %arg0 : i32 to index
    %c2 = arith.constant 2 : index
    %5 = memref.load %arg2[%4, %c2] : memref<2x9xf32, #tpu.memory_space<smem>>
    %6 = arith.index_cast %arg0 : i32 to index
    %c3 = arith.constant 3 : index
    %7 = memref.load %arg2[%6, %c3] : memref<2x9xf32, #tpu.memory_space<smem>>
    %8 = arith.index_cast %arg0 : i32 to index
    %c4 = arith.constant 4 : index
    %9 = memref.load %arg2[%8, %c4] : memref<2x9xf32, #tpu.memory_space<smem>>
    %10 = arith.index_cast %arg0 : i32 to index
    %c5 = arith.constant 5 : index
    %11 = memref.load %arg2[%10, %c5] : memref<2x9xf32, #tpu.memory_space<smem>>
    %12 = arith.index_cast %arg0 : i32 to index
    %c6 = arith.constant 6 : index
    %13 = memref.load %arg2[%12, %c6] : memref<2x9xf32, #tpu.memory_space<smem>>
    %14 = arith.index_cast %arg0 : i32 to index
    %c7 = arith.constant 7 : index
    %15 = memref.load %arg2[%14, %c7] : memref<2x9xf32, #tpu.memory_space<smem>>
    %16 = arith.index_cast %arg0 : i32 to index
    %c8 = arith.constant 8 : index
    %17 = memref.load %arg2[%16, %c8] : memref<2x9xf32, #tpu.memory_space<smem>>
    %c0_0 = arith.constant 0 : index
    %c0_1 = arith.constant 0 : index
    %18 = vector.load %arg5[%c0_0, %c0_1] : memref<4x16xf32, #tpu.memory_space<vmem>>, vector<4x16xf32>
    %c0_2 = arith.constant 0 : index
    %c0_3 = arith.constant 0 : index
    %19 = vector.load %arg6[%c0_2, %c0_3] : memref<16x4xf32, #tpu.memory_space<vmem>>, vector<16x4xf32>
    %c0_4 = arith.constant 0 : index
    %c0_5 = arith.constant 0 : index
    %c0_6 = arith.constant 0 : index
    %c0_7 = arith.constant 0 : index
    %20 = vector.load %arg3[%c0_4, %c0_5, %c0_6, %c0_7] : memref<1x48x4x4xf32, #tpu.memory_space<vmem>>, vector<1x1x4x4xf32>
    %21 = vector.shape_cast %20 : vector<1x1x4x4xf32> to vector<4x4xf32>
    %22 = vector.broadcast %1 : f32 to vector<4x4xf32>
    %23 = arith.mulf %22, %21 : vector<4x4xf32>
    %c0_8 = arith.constant 0 : index
    %c1_9 = arith.constant 1 : index
    %c0_10 = arith.constant 0 : index
    %c0_11 = arith.constant 0 : index
    %24 = vector.load %arg3[%c0_8, %c1_9, %c0_10, %c0_11] : memref<1x48x4x4xf32, #tpu.memory_space<vmem>>, vector<1x1x4x4xf32>
    %25 = vector.shape_cast %24 : vector<1x1x4x4xf32> to vector<4x4xf32>
    %26 = vector.broadcast %3 : f32 to vector<4x4xf32>
    %27 = arith.mulf %26, %25 : vector<4x4xf32>
    %28 = arith.addf %23, %27 : vector<4x4xf32>
    %c0_12 = arith.constant 0 : index
    %c2_13 = arith.constant 2 : index
    %c0_14 = arith.constant 0 : index
    %c0_15 = arith.constant 0 : index
    %29 = vector.load %arg3[%c0_12, %c2_13, %c0_14, %c0_15] : memref<1x48x4x4xf32, #tpu.memory_space<vmem>>, vector<1x1x4x4xf32>
    %30 = vector.shape_cast %29 : vector<1x1x4x4xf32> to vector<4x4xf32>
    %31 = vector.broadcast %5 : f32 to vector<4x4xf32>
    %32 = arith.mulf %31, %30 : vector<4x4xf32>
    %33 = arith.addf %28, %32 : vector<4x4xf32>
    %c0_16 = arith.constant 0 : index
    %c4_17 = arith.constant 4 : index
    %c0_18 = arith.constant 0 : index
    %c0_19 = arith.constant 0 : index
    %34 = vector.load %arg3[%c0_16, %c4_17, %c0_18, %c0_19] : memref<1x48x4x4xf32, #tpu.memory_space<vmem>>, vector<1x1x4x4xf32>
    %35 = vector.shape_cast %34 : vector<1x1x4x4xf32> to vector<4x4xf32>
    %36 = vector.broadcast %7 : f32 to vector<4x4xf32>
    %37 = arith.mulf %36, %35 : vector<4x4xf32>
    %38 = arith.addf %33, %37 : vector<4x4xf32>
    %c0_20 = arith.constant 0 : index
    %c5_21 = arith.constant 5 : index
    %c0_22 = arith.constant 0 : index
    %c0_23 = arith.constant 0 : index
    %39 = vector.load %arg3[%c0_20, %c5_21, %c0_22, %c0_23] : memref<1x48x4x4xf32, #tpu.memory_space<vmem>>, vector<1x1x4x4xf32>
    %40 = vector.shape_cast %39 : vector<1x1x4x4xf32> to vector<4x4xf32>
    %41 = vector.broadcast %9 : f32 to vector<4x4xf32>
    %42 = arith.mulf %41, %40 : vector<4x4xf32>
    %43 = arith.addf %38, %42 : vector<4x4xf32>
    %c0_24 = arith.constant 0 : index
    %c6_25 = arith.constant 6 : index
    %c0_26 = arith.constant 0 : index
    %c0_27 = arith.constant 0 : index
    %44 = vector.load %arg3[%c0_24, %c6_25, %c0_26, %c0_27] : memref<1x48x4x4xf32, #tpu.memory_space<vmem>>, vector<1x1x4x4xf32>
    %45 = vector.shape_cast %44 : vector<1x1x4x4xf32> to vector<4x4xf32>
    %46 = vector.broadcast %11 : f32 to vector<4x4xf32>
    %47 = arith.mulf %46, %45 : vector<4x4xf32>
    %48 = arith.addf %43, %47 : vector<4x4xf32>
    %c0_28 = arith.constant 0 : index
    %c8_29 = arith.constant 8 : index
    %c0_30 = arith.constant 0 : index
    %c0_31 = arith.constant 0 : index
    %49 = vector.load %arg3[%c0_28, %c8_29, %c0_30, %c0_31] : memref<1x48x4x4xf32, #tpu.memory_space<vmem>>, vector<1x1x4x4xf32>
    %50 = vector.shape_cast %49 : vector<1x1x4x4xf32> to vector<4x4xf32>
    %51 = vector.broadcast %13 : f32 to vector<4x4xf32>
    %52 = arith.mulf %51, %50 : vector<4x4xf32>
    %53 = arith.addf %48, %52 : vector<4x4xf32>
    %c0_32 = arith.constant 0 : index
    %c9 = arith.constant 9 : index
    %c0_33 = arith.constant 0 : index
    %c0_34 = arith.constant 0 : index
    %54 = vector.load %arg3[%c0_32, %c9, %c0_33, %c0_34] : memref<1x48x4x4xf32, #tpu.memory_space<vmem>>, vector<1x1x4x4xf32>
    %55 = vector.shape_cast %54 : vector<1x1x4x4xf32> to vector<4x4xf32>
    %56 = vector.broadcast %15 : f32 to vector<4x4xf32>
    %57 = arith.mulf %56, %55 : vector<4x4xf32>
    %58 = arith.addf %53, %57 : vector<4x4xf32>
    %c0_35 = arith.constant 0 : index
    %c10 = arith.constant 10 : index
    %c0_36 = arith.constant 0 : index
    %c0_37 = arith.constant 0 : index
    %59 = vector.load %arg3[%c0_35, %c10, %c0_36, %c0_37] : memref<1x48x4x4xf32, #tpu.memory_space<vmem>>, vector<1x1x4x4xf32>
    %60 = vector.shape_cast %59 : vector<1x1x4x4xf32> to vector<4x4xf32>
    %61 = vector.broadcast %17 : f32 to vector<4x4xf32>
    %62 = arith.mulf %61, %60 : vector<4x4xf32>
    %63 = arith.addf %58, %62 : vector<4x4xf32>
    %c0_38 = arith.constant 0 : index
    %c0_39 = arith.constant 0 : index
    %c0_40 = arith.constant 0 : index
    %c0_41 = arith.constant 0 : index
    %64 = vector.load %arg4[%c0_38, %c0_39, %c0_40, %c0_41] : memref<1x3x16x16xf32, #tpu.memory_space<vmem>>, vector<1x1x16x16xf32>
    %65 = vector.shape_cast %64 : vector<1x1x16x16xf32> to vector<16x16xf32>
    %cst = arith.constant dense<0.000000e+00> : vector<4x16xf32>
    %66 = tpu.matmul %18, %65, %cst {dimension_numbers = #tpu.dot_dimension_numbers<[1], [0], [0], [1], [0, 0, 1, 1], [], []>} : vector<4x16xf32>, vector<16x16xf32>, vector<4x16xf32> -> vector<4x16xf32>
    %cst_42 = arith.constant dense<0.000000e+00> : vector<4x4xf32>
    %67 = tpu.matmul %66, %19, %cst_42 {dimension_numbers = #tpu.dot_dimension_numbers<[1], [0], [0], [1], [0, 0, 1, 1], [], []>} : vector<4x16xf32>, vector<16x4xf32>, vector<4x4xf32> -> vector<4x4xf32>
    %cst_43 = arith.constant 1602.21228 : f32
    %68 = vector.broadcast %cst_43 : f32 to vector<4x4xf32>
    %69 = arith.mulf %68, %67 : vector<4x4xf32>
    %70 = math.sin %69 : vector<4x4xf32>
    %71 = math.cos %69 : vector<4x4xf32>
    %cst_44 = arith.constant 0.00124827411 : f32
    %72 = vector.broadcast %cst_44 : f32 to vector<4x4xf32>
    %73 = arith.mulf %72, %70 : vector<4x4xf32>
    %74 = arith.subf %67, %73 : vector<4x4xf32>
    %75 = arith.mulf %70, %71 : vector<4x4xf32>
    %76 = arith.mulf %71, %70 : vector<4x4xf32>
    %77 = arith.addf %75, %76 : vector<4x4xf32>
    %78 = arith.mulf %71, %71 : vector<4x4xf32>
    %79 = arith.mulf %70, %70 : vector<4x4xf32>
    %80 = arith.subf %78, %79 : vector<4x4xf32>
    %cst_45 = arith.constant 6.24137057E-4 : f32
    %81 = vector.broadcast %cst_45 : f32 to vector<4x4xf32>
    %82 = arith.mulf %81, %77 : vector<4x4xf32>
    %83 = arith.addf %74, %82 : vector<4x4xf32>
    %84 = arith.mulf %77, %71 : vector<4x4xf32>
    %85 = arith.mulf %80, %70 : vector<4x4xf32>
    %86 = arith.addf %84, %85 : vector<4x4xf32>
    %87 = arith.mulf %80, %71 : vector<4x4xf32>
    %88 = arith.mulf %77, %70 : vector<4x4xf32>
    %89 = arith.subf %87, %88 : vector<4x4xf32>
    %cst_46 = arith.constant -4.16091352E-4 : f32
    %90 = vector.broadcast %cst_46 : f32 to vector<4x4xf32>
    %91 = arith.mulf %90, %86 : vector<4x4xf32>
    %92 = arith.addf %83, %91 : vector<4x4xf32>
    %93 = arith.mulf %86, %71 : vector<4x4xf32>
    %94 = arith.mulf %89, %70 : vector<4x4xf32>
    %95 = arith.addf %93, %94 : vector<4x4xf32>
    %96 = arith.mulf %89, %71 : vector<4x4xf32>
    %97 = arith.mulf %86, %70 : vector<4x4xf32>
    %98 = arith.subf %96, %97 : vector<4x4xf32>
    %cst_47 = arith.constant 3.12068529E-4 : f32
    %99 = vector.broadcast %cst_47 : f32 to vector<4x4xf32>
    %100 = arith.mulf %99, %95 : vector<4x4xf32>
    %101 = arith.addf %92, %100 : vector<4x4xf32>
    %102 = arith.mulf %95, %71 : vector<4x4xf32>
    %103 = arith.mulf %98, %70 : vector<4x4xf32>
    %104 = arith.addf %102, %103 : vector<4x4xf32>
    %cst_48 = arith.constant -2.49654811E-4 : f32
    %105 = vector.broadcast %cst_48 : f32 to vector<4x4xf32>
    %106 = arith.mulf %105, %104 : vector<4x4xf32>
    %107 = arith.addf %101, %106 : vector<4x4xf32>
    %108 = arith.addf %63, %107 : vector<4x4xf32>
    %c0_49 = arith.constant 0 : index
    %c0_50 = arith.constant 0 : index
    %c0_51 = arith.constant 0 : index
    %c0_52 = arith.constant 0 : index
    %109 = vector.load %arg7[%c0_49, %c0_50, %c0_51, %c0_52] : memref<1x3x4x4xf32, #tpu.memory_space<vmem>>, vector<1x1x4x4xf32>
    %110 = vector.shape_cast %109 : vector<1x1x4x4xf32> to vector<4x4xf32>
    %111 = vector.shape_cast %108 : vector<4x4xf32> to vector<1x1x4x4xf32>
    tpu.vector_store %arg7[%c0_49, %c0_50, %c0_51, %c0_52], %111 {strides = array<i32>} : memref<1x3x4x4xf32, #tpu.memory_space<vmem>>, vector<1x1x4x4xf32>,
    %c0_53 = arith.constant 0 : index
    %c16 = arith.constant 16 : index
    %c0_54 = arith.constant 0 : index
    %c0_55 = arith.constant 0 : index
    %112 = vector.load %arg3[%c0_53, %c16, %c0_54, %c0_55] : memref<1x48x4x4xf32, #tpu.memory_space<vmem>>, vector<1x1x4x4xf32>
    %113 = vector.shape_cast %112 : vector<1x1x4x4xf32> to vector<4x4xf32>
    %114 = vector.broadcast %1 : f32 to vector<4x4xf32>
    %115 = arith.mulf %114, %113 : vector<4x4xf32>
    %c0_56 = arith.constant 0 : index
    %c17 = arith.constant 17 : index
    %c0_57 = arith.constant 0 : index
    %c0_58 = arith.constant 0 : index
    %116 = vector.load %arg3[%c0_56, %c17, %c0_57, %c0_58] : memref<1x48x4x4xf32, #tpu.memory_space<vmem>>, vector<1x1x4x4xf32>
    %117 = vector.shape_cast %116 : vector<1x1x4x4xf32> to vector<4x4xf32>
    %118 = vector.broadcast %3 : f32 to vector<4x4xf32>
    %119 = arith.mulf %118, %117 : vector<4x4xf32>
    %120 = arith.addf %115, %119 : vector<4x4xf32>
    %c0_59 = arith.constant 0 : index
    %c18 = arith.constant 18 : index
    %c0_60 = arith.constant 0 : index
    %c0_61 = arith.constant 0 : index
    %121 = vector.load %arg3[%c0_59, %c18, %c0_60, %c0_61] : memref<1x48x4x4xf32, #tpu.memory_space<vmem>>, vector<1x1x4x4xf32>
    %122 = vector.shape_cast %121 : vector<1x1x4x4xf32> to vector<4x4xf32>
    %123 = vector.broadcast %5 : f32 to vector<4x4xf32>
    %124 = arith.mulf %123, %122 : vector<4x4xf32>
    %125 = arith.addf %120, %124 : vector<4x4xf32>
    %c0_62 = arith.constant 0 : index
    %c20 = arith.constant 20 : index
    %c0_63 = arith.constant 0 : index
    %c0_64 = arith.constant 0 : index
    %126 = vector.load %arg3[%c0_62, %c20, %c0_63, %c0_64] : memref<1x48x4x4xf32, #tpu.memory_space<vmem>>, vector<1x1x4x4xf32>
    %127 = vector.shape_cast %126 : vector<1x1x4x4xf32> to vector<4x4xf32>
    %128 = vector.broadcast %7 : f32 to vector<4x4xf32>
    %129 = arith.mulf %128, %127 : vector<4x4xf32>
    %130 = arith.addf %125, %129 : vector<4x4xf32>
    %c0_65 = arith.constant 0 : index
    %c21 = arith.constant 21 : index
    %c0_66 = arith.constant 0 : index
    %c0_67 = arith.constant 0 : index
    %131 = vector.load %arg3[%c0_65, %c21, %c0_66, %c0_67] : memref<1x48x4x4xf32, #tpu.memory_space<vmem>>, vector<1x1x4x4xf32>
    %132 = vector.shape_cast %131 : vector<1x1x4x4xf32> to vector<4x4xf32>
    %133 = vector.broadcast %9 : f32 to vector<4x4xf32>
    %134 = arith.mulf %133, %132 : vector<4x4xf32>
    %135 = arith.addf %130, %134 : vector<4x4xf32>
    %c0_68 = arith.constant 0 : index
    %c22 = arith.constant 22 : index
    %c0_69 = arith.constant 0 : index
    %c0_70 = arith.constant 0 : index
    %136 = vector.load %arg3[%c0_68, %c22, %c0_69, %c0_70] : memref<1x48x4x4xf32, #tpu.memory_space<vmem>>, vector<1x1x4x4xf32>
    %137 = vector.shape_cast %136 : vector<1x1x4x4xf32> to vector<4x4xf32>
    %138 = vector.broadcast %11 : f32 to vector<4x4xf32>
    %139 = arith.mulf %138, %137 : vector<4x4xf32>
    %140 = arith.addf %135, %139 : vector<4x4xf32>
    %c0_71 = arith.constant 0 : index
    %c24 = arith.constant 24 : index
    %c0_72 = arith.constant 0 : index
    %c0_73 = arith.constant 0 : index
    %141 = vector.load %arg3[%c0_71, %c24, %c0_72, %c0_73] : memref<1x48x4x4xf32, #tpu.memory_space<vmem>>, vector<1x1x4x4xf32>
    %142 = vector.shape_cast %141 : vector<1x1x4x4xf32> to vector<4x4xf32>
    %143 = vector.broadcast %13 : f32 to vector<4x4xf32>
    %144 = arith.mulf %143, %142 : vector<4x4xf32>
    %145 = arith.addf %140, %144 : vector<4x4xf32>
    %c0_74 = arith.constant 0 : index
    %c25 = arith.constant 25 : index
    %c0_75 = arith.constant 0 : index
    %c0_76 = arith.constant 0 : index
    %146 = vector.load %arg3[%c0_74, %c25, %c0_75, %c0_76] : memref<1x48x4x4xf32, #tpu.memory_space<vmem>>, vector<1x1x4x4xf32>
    %147 = vector.shape_cast %146 : vector<1x1x4x4xf32> to vector<4x4xf32>
    %148 = vector.broadcast %15 : f32 to vector<4x4xf32>
    %149 = arith.mulf %148, %147 : vector<4x4xf32>
    %150 = arith.addf %145, %149 : vector<4x4xf32>
    %c0_77 = arith.constant 0 : index
    %c26 = arith.constant 26 : index
    %c0_78 = arith.constant 0 : index
    %c0_79 = arith.constant 0 : index
    %151 = vector.load %arg3[%c0_77, %c26, %c0_78, %c0_79] : memref<1x48x4x4xf32, #tpu.memory_space<vmem>>, vector<1x1x4x4xf32>
    %152 = vector.shape_cast %151 : vector<1x1x4x4xf32> to vector<4x4xf32>
    %153 = vector.broadcast %17 : f32 to vector<4x4xf32>
    %154 = arith.mulf %153, %152 : vector<4x4xf32>
    %155 = arith.addf %150, %154 : vector<4x4xf32>
    %c0_80 = arith.constant 0 : index
    %c1_81 = arith.constant 1 : index
    %c0_82 = arith.constant 0 : index
    %c0_83 = arith.constant 0 : index
    %156 = vector.load %arg4[%c0_80, %c1_81, %c0_82, %c0_83] : memref<1x3x16x16xf32, #tpu.memory_space<vmem>>, vector<1x1x16x16xf32>
    %157 = vector.shape_cast %156 : vector<1x1x16x16xf32> to vector<16x16xf32>
    %cst_84 = arith.constant dense<0.000000e+00> : vector<4x16xf32>
    %158 = tpu.matmul %18, %157, %cst_84 {dimension_numbers = #tpu.dot_dimension_numbers<[1], [0], [0], [1], [0, 0, 1, 1], [], []>} : vector<4x16xf32>, vector<16x16xf32>, vector<4x16xf32> -> vector<4x16xf32>
    %cst_85 = arith.constant dense<0.000000e+00> : vector<4x4xf32>
    %159 = tpu.matmul %158, %19, %cst_85 {dimension_numbers = #tpu.dot_dimension_numbers<[1], [0], [0], [1], [0, 0, 1, 1], [], []>} : vector<4x16xf32>, vector<16x4xf32>, vector<4x4xf32> -> vector<4x4xf32>
    %cst_86 = arith.constant 1602.21228 : f32
    %160 = vector.broadcast %cst_86 : f32 to vector<4x4xf32>
    %161 = arith.mulf %160, %159 : vector<4x4xf32>
    %162 = math.sin %161 : vector<4x4xf32>
    %163 = math.cos %161 : vector<4x4xf32>
    %cst_87 = arith.constant 0.00124827411 : f32
    %164 = vector.broadcast %cst_87 : f32 to vector<4x4xf32>
    %165 = arith.mulf %164, %162 : vector<4x4xf32>
    %166 = arith.subf %159, %165 : vector<4x4xf32>
    %167 = arith.mulf %162, %163 : vector<4x4xf32>
    %168 = arith.mulf %163, %162 : vector<4x4xf32>
    %169 = arith.addf %167, %168 : vector<4x4xf32>
    %170 = arith.mulf %163, %163 : vector<4x4xf32>
    %171 = arith.mulf %162, %162 : vector<4x4xf32>
    %172 = arith.subf %170, %171 : vector<4x4xf32>
    %cst_88 = arith.constant 6.24137057E-4 : f32
    %173 = vector.broadcast %cst_88 : f32 to vector<4x4xf32>
    %174 = arith.mulf %173, %169 : vector<4x4xf32>
    %175 = arith.addf %166, %174 : vector<4x4xf32>
    %176 = arith.mulf %169, %163 : vector<4x4xf32>
    %177 = arith.mulf %172, %162 : vector<4x4xf32>
    %178 = arith.addf %176, %177 : vector<4x4xf32>
    %179 = arith.mulf %172, %163 : vector<4x4xf32>
    %180 = arith.mulf %169, %162 : vector<4x4xf32>
    %181 = arith.subf %179, %180 : vector<4x4xf32>
    %cst_89 = arith.constant -4.16091352E-4 : f32
    %182 = vector.broadcast %cst_89 : f32 to vector<4x4xf32>
    %183 = arith.mulf %182, %178 : vector<4x4xf32>
    %184 = arith.addf %175, %183 : vector<4x4xf32>
    %185 = arith.mulf %178, %163 : vector<4x4xf32>
    %186 = arith.mulf %181, %162 : vector<4x4xf32>
    %187 = arith.addf %185, %186 : vector<4x4xf32>
    %188 = arith.mulf %181, %163 : vector<4x4xf32>
    %189 = arith.mulf %178, %162 : vector<4x4xf32>
    %190 = arith.subf %188, %189 : vector<4x4xf32>
    %cst_90 = arith.constant 3.12068529E-4 : f32
    %191 = vector.broadcast %cst_90 : f32 to vector<4x4xf32>
    %192 = arith.mulf %191, %187 : vector<4x4xf32>
    %193 = arith.addf %184, %192 : vector<4x4xf32>
    %194 = arith.mulf %187, %163 : vector<4x4xf32>
    %195 = arith.mulf %190, %162 : vector<4x4xf32>
    %196 = arith.addf %194, %195 : vector<4x4xf32>
    %cst_91 = arith.constant -2.49654811E-4 : f32
    %197 = vector.broadcast %cst_91 : f32 to vector<4x4xf32>
    %198 = arith.mulf %197, %196 : vector<4x4xf32>
    %199 = arith.addf %193, %198 : vector<4x4xf32>
    %200 = arith.addf %155, %199 : vector<4x4xf32>
    %c0_92 = arith.constant 0 : index
    %c1_93 = arith.constant 1 : index
    %c0_94 = arith.constant 0 : index
    %c0_95 = arith.constant 0 : index
    %201 = vector.load %arg7[%c0_92, %c1_93, %c0_94, %c0_95] : memref<1x3x4x4xf32, #tpu.memory_space<vmem>>, vector<1x1x4x4xf32>
    %202 = vector.shape_cast %201 : vector<1x1x4x4xf32> to vector<4x4xf32>
    %203 = vector.shape_cast %200 : vector<4x4xf32> to vector<1x1x4x4xf32>
    tpu.vector_store %arg7[%c0_92, %c1_93, %c0_94, %c0_95], %203 {strides = array<i32>} : memref<1x3x4x4xf32, #tpu.memory_space<vmem>>, vector<1x1x4x4xf32>,
    %c0_96 = arith.constant 0 : index
    %c32 = arith.constant 32 : index
    %c0_97 = arith.constant 0 : index
    %c0_98 = arith.constant 0 : index
    %204 = vector.load %arg3[%c0_96, %c32, %c0_97, %c0_98] : memref<1x48x4x4xf32, #tpu.memory_space<vmem>>, vector<1x1x4x4xf32>
    %205 = vector.shape_cast %204 : vector<1x1x4x4xf32> to vector<4x4xf32>
    %206 = vector.broadcast %1 : f32 to vector<4x4xf32>
    %207 = arith.mulf %206, %205 : vector<4x4xf32>
    %c0_99 = arith.constant 0 : index
    %c33 = arith.constant 33 : index
    %c0_100 = arith.constant 0 : index
    %c0_101 = arith.constant 0 : index
    %208 = vector.load %arg3[%c0_99, %c33, %c0_100, %c0_101] : memref<1x48x4x4xf32, #tpu.memory_space<vmem>>, vector<1x1x4x4xf32>
    %209 = vector.shape_cast %208 : vector<1x1x4x4xf32> to vector<4x4xf32>
    %210 = vector.broadcast %3 : f32 to vector<4x4xf32>
    %211 = arith.mulf %210, %209 : vector<4x4xf32>
    %212 = arith.addf %207, %211 : vector<4x4xf32>
    %c0_102 = arith.constant 0 : index
    %c34 = arith.constant 34 : index
    %c0_103 = arith.constant 0 : index
    %c0_104 = arith.constant 0 : index
    %213 = vector.load %arg3[%c0_102, %c34, %c0_103, %c0_104] : memref<1x48x4x4xf32, #tpu.memory_space<vmem>>, vector<1x1x4x4xf32>
    %214 = vector.shape_cast %213 : vector<1x1x4x4xf32> to vector<4x4xf32>
    %215 = vector.broadcast %5 : f32 to vector<4x4xf32>
    %216 = arith.mulf %215, %214 : vector<4x4xf32>
    %217 = arith.addf %212, %216 : vector<4x4xf32>
    %c0_105 = arith.constant 0 : index
    %c36 = arith.constant 36 : index
    %c0_106 = arith.constant 0 : index
    %c0_107 = arith.constant 0 : index
    %218 = vector.load %arg3[%c0_105, %c36, %c0_106, %c0_107] : memref<1x48x4x4xf32, #tpu.memory_space<vmem>>, vector<1x1x4x4xf32>
    %219 = vector.shape_cast %218 : vector<1x1x4x4xf32> to vector<4x4xf32>
    %220 = vector.broadcast %7 : f32 to vector<4x4xf32>
    %221 = arith.mulf %220, %219 : vector<4x4xf32>
    %222 = arith.addf %217, %221 : vector<4x4xf32>
    %c0_108 = arith.constant 0 : index
    %c37 = arith.constant 37 : index
    %c0_109 = arith.constant 0 : index
    %c0_110 = arith.constant 0 : index
    %223 = vector.load %arg3[%c0_108, %c37, %c0_109, %c0_110] : memref<1x48x4x4xf32, #tpu.memory_space<vmem>>, vector<1x1x4x4xf32>
    %224 = vector.shape_cast %223 : vector<1x1x4x4xf32> to vector<4x4xf32>
    %225 = vector.broadcast %9 : f32 to vector<4x4xf32>
    %226 = arith.mulf %225, %224 : vector<4x4xf32>
    %227 = arith.addf %222, %226 : vector<4x4xf32>
    %c0_111 = arith.constant 0 : index
    %c38 = arith.constant 38 : index
    %c0_112 = arith.constant 0 : index
    %c0_113 = arith.constant 0 : index
    %228 = vector.load %arg3[%c0_111, %c38, %c0_112, %c0_113] : memref<1x48x4x4xf32, #tpu.memory_space<vmem>>, vector<1x1x4x4xf32>
    %229 = vector.shape_cast %228 : vector<1x1x4x4xf32> to vector<4x4xf32>
    %230 = vector.broadcast %11 : f32 to vector<4x4xf32>
    %231 = arith.mulf %230, %229 : vector<4x4xf32>
    %232 = arith.addf %227, %231 : vector<4x4xf32>
    %c0_114 = arith.constant 0 : index
    %c40 = arith.constant 40 : index
    %c0_115 = arith.constant 0 : index
    %c0_116 = arith.constant 0 : index
    %233 = vector.load %arg3[%c0_114, %c40, %c0_115, %c0_116] : memref<1x48x4x4xf32, #tpu.memory_space<vmem>>, vector<1x1x4x4xf32>
    %234 = vector.shape_cast %233 : vector<1x1x4x4xf32> to vector<4x4xf32>
    %235 = vector.broadcast %13 : f32 to vector<4x4xf32>
    %236 = arith.mulf %235, %234 : vector<4x4xf32>
    %237 = arith.addf %232, %236 : vector<4x4xf32>
    %c0_117 = arith.constant 0 : index
    %c41 = arith.constant 41 : index
    %c0_118 = arith.constant 0 : index
    %c0_119 = arith.constant 0 : index
    %238 = vector.load %arg3[%c0_117, %c41, %c0_118, %c0_119] : memref<1x48x4x4xf32, #tpu.memory_space<vmem>>, vector<1x1x4x4xf32>
    %239 = vector.shape_cast %238 : vector<1x1x4x4xf32> to vector<4x4xf32>
    %240 = vector.broadcast %15 : f32 to vector<4x4xf32>
    %241 = arith.mulf %240, %239 : vector<4x4xf32>
    %242 = arith.addf %237, %241 : vector<4x4xf32>
    %c0_120 = arith.constant 0 : index
    %c42 = arith.constant 42 : index
    %c0_121 = arith.constant 0 : index
    %c0_122 = arith.constant 0 : index
    %243 = vector.load %arg3[%c0_120, %c42, %c0_121, %c0_122] : memref<1x48x4x4xf32, #tpu.memory_space<vmem>>, vector<1x1x4x4xf32>
    %244 = vector.shape_cast %243 : vector<1x1x4x4xf32> to vector<4x4xf32>
    %245 = vector.broadcast %17 : f32 to vector<4x4xf32>
    %246 = arith.mulf %245, %244 : vector<4x4xf32>
    %247 = arith.addf %242, %246 : vector<4x4xf32>
    %c0_123 = arith.constant 0 : index
    %c2_124 = arith.constant 2 : index
    %c0_125 = arith.constant 0 : index
    %c0_126 = arith.constant 0 : index
    %248 = vector.load %arg4[%c0_123, %c2_124, %c0_125, %c0_126] : memref<1x3x16x16xf32, #tpu.memory_space<vmem>>, vector<1x1x16x16xf32>
    %249 = vector.shape_cast %248 : vector<1x1x16x16xf32> to vector<16x16xf32>
    %cst_127 = arith.constant dense<0.000000e+00> : vector<4x16xf32>
    %250 = tpu.matmul %18, %249, %cst_127 {dimension_numbers = #tpu.dot_dimension_numbers<[1], [0], [0], [1], [0, 0, 1, 1], [], []>} : vector<4x16xf32>, vector<16x16xf32>, vector<4x16xf32> -> vector<4x16xf32>
    %cst_128 = arith.constant dense<0.000000e+00> : vector<4x4xf32>
    %251 = tpu.matmul %250, %19, %cst_128 {dimension_numbers = #tpu.dot_dimension_numbers<[1], [0], [0], [1], [0, 0, 1, 1], [], []>} : vector<4x16xf32>, vector<16x4xf32>, vector<4x4xf32> -> vector<4x4xf32>
    %cst_129 = arith.constant 1602.21228 : f32
    %252 = vector.broadcast %cst_129 : f32 to vector<4x4xf32>
    %253 = arith.mulf %252, %251 : vector<4x4xf32>
    %254 = math.sin %253 : vector<4x4xf32>
    %255 = math.cos %253 : vector<4x4xf32>
    %cst_130 = arith.constant 0.00124827411 : f32
    %256 = vector.broadcast %cst_130 : f32 to vector<4x4xf32>
    %257 = arith.mulf %256, %254 : vector<4x4xf32>
    %258 = arith.subf %251, %257 : vector<4x4xf32>
    %259 = arith.mulf %254, %255 : vector<4x4xf32>
    %260 = arith.mulf %255, %254 : vector<4x4xf32>
    %261 = arith.addf %259, %260 : vector<4x4xf32>
    %262 = arith.mulf %255, %255 : vector<4x4xf32>
    %263 = arith.mulf %254, %254 : vector<4x4xf32>
    %264 = arith.subf %262, %263 : vector<4x4xf32>
    %cst_131 = arith.constant 6.24137057E-4 : f32
    %265 = vector.broadcast %cst_131 : f32 to vector<4x4xf32>
    %266 = arith.mulf %265, %261 : vector<4x4xf32>
    %267 = arith.addf %258, %266 : vector<4x4xf32>
    %268 = arith.mulf %261, %255 : vector<4x4xf32>
    %269 = arith.mulf %264, %254 : vector<4x4xf32>
    %270 = arith.addf %268, %269 : vector<4x4xf32>
    %271 = arith.mulf %264, %255 : vector<4x4xf32>
    %272 = arith.mulf %261, %254 : vector<4x4xf32>
    %273 = arith.subf %271, %272 : vector<4x4xf32>
    %cst_132 = arith.constant -4.16091352E-4 : f32
    %274 = vector.broadcast %cst_132 : f32 to vector<4x4xf32>
    %275 = arith.mulf %274, %270 : vector<4x4xf32>
    %276 = arith.addf %267, %275 : vector<4x4xf32>
    %277 = arith.mulf %270, %255 : vector<4x4xf32>
    %278 = arith.mulf %273, %254 : vector<4x4xf32>
    %279 = arith.addf %277, %278 : vector<4x4xf32>
    %280 = arith.mulf %273, %255 : vector<4x4xf32>
    %281 = arith.mulf %270, %254 : vector<4x4xf32>
    %282 = arith.subf %280, %281 : vector<4x4xf32>
    %cst_133 = arith.constant 3.12068529E-4 : f32
    %283 = vector.broadcast %cst_133 : f32 to vector<4x4xf32>
    %284 = arith.mulf %283, %279 : vector<4x4xf32>
    %285 = arith.addf %276, %284 : vector<4x4xf32>
    %286 = arith.mulf %279, %255 : vector<4x4xf32>
    %287 = arith.mulf %282, %254 : vector<4x4xf32>
    %288 = arith.addf %286, %287 : vector<4x4xf32>
    %cst_134 = arith.constant -2.49654811E-4 : f32
    %289 = vector.broadcast %cst_134 : f32 to vector<4x4xf32>
    %290 = arith.mulf %289, %288 : vector<4x4xf32>
    %291 = arith.addf %285, %290 : vector<4x4xf32>
    %292 = arith.addf %247, %291 : vector<4x4xf32>
    %c0_135 = arith.constant 0 : index
    %c2_136 = arith.constant 2 : index
    %c0_137 = arith.constant 0 : index
    %c0_138 = arith.constant 0 : index
    %293 = vector.load %arg7[%c0_135, %c2_136, %c0_137, %c0_138] : memref<1x3x4x4xf32, #tpu.memory_space<vmem>>, vector<1x1x4x4xf32>
    %294 = vector.shape_cast %293 : vector<1x1x4x4xf32> to vector<4x4xf32>
    %295 = vector.shape_cast %292 : vector<4x4xf32> to vector<1x1x4x4xf32>
    tpu.vector_store %arg7[%c0_135, %c2_136, %c0_137, %c0_138], %295 {strides = array<i32>} : memref<1x3x4x4xf32, #tpu.memory_space<vmem>>, vector<1x1x4x4xf32>,
    return
  }
  func.func @transform_0(%arg0: i32, %arg1: i32) -> (i32, i32) {
    %c0_i32 = arith.constant 0 : i32
    %c0_i32_0 = arith.constant 0 : i32
    %c0_i32_1 = arith.constant 0 : i32
    return %c0_i32, %c0_i32_0 : i32, i32
  }
  func.func @transform_1(%arg0: i32, %arg1: i32) -> (i32, i32, i32, i32) {
    %c0_i32 = arith.constant 0 : i32
    %c0_i32_0 = arith.constant 0 : i32
    %c0_i32_1 = arith.constant 0 : i32
    return %arg0, %c0_i32, %arg1, %c0_i32_0 : i32, i32, i32, i32
  }
  func.func @transform_2(%arg0: i32, %arg1: i32) -> (i32, i32, i32, i32) {
    %c0_i32 = arith.constant 0 : i32
    %c0_i32_0 = arith.constant 0 : i32
    %c0_i32_1 = arith.constant 0 : i32
    return %arg0, %c0_i32, %arg1, %c0_i32_0 : i32, i32, i32, i32
  }
  func.func @transform_3(%arg0: i32, %arg1: i32) -> (i32, i32) {
    %c0_i32 = arith.constant 0 : i32
    return %arg1, %arg1 : i32, i32
  }
  func.func @transform_4(%arg0: i32, %arg1: i32) -> (i32, i32) {
    %c0_i32 = arith.constant 0 : i32
    %c0_i32_0 = arith.constant 0 : i32
    %c0_i32_1 = arith.constant 0 : i32
    return %c0_i32, %c0_i32_0 : i32, i32
  }
  func.func @transform_5(%arg0: i32, %arg1: i32) -> (i32, i32, i32, i32) {
    %c0_i32 = arith.constant 0 : i32
    %c0_i32_0 = arith.constant 0 : i32
    %c0_i32_1 = arith.constant 0 : i32
    return %arg0, %c0_i32, %arg1, %c0_i32_0 : i32, i32, i32, i32
  }
}

</mosaic_0001>

<bundles_post_ra>
// kernel: tpu_custom_call.1
= control target key start
LH: loop header
LB: loop body
LE: loop exit
PB: predicated region body
PF: predicated region fallthrough
CT: control target
= control target key end

     0   :  { %10 = vsyncpa [#allocation4], 0  ;;  %s2644_s0 = inlined_call_operand.vmem [shape: f32[2,9], index: 0, kind: input, shape index: {}]   ;;  %s2645_s1 = inlined_call_operand.vmem [shape: f32[2,48,4,4], index: 1, kind: input, shape index: {}]   ;;  %s2646_s2 = inlined_call_operand.vmem [shape: f32[2,3,16,16], index: 2, kind: input, shape index: {}]   ;;  %s2647_s3 = inlined_call_operand.vmem [shape: f32[4,16], index: 3, kind: input, shape index: {}]   ;;  %s2648_s4 = inlined_call_operand.vmem [shape: f32[16,4], index: 4, kind: input, shape index: {}]   ;;  %s2649_s5 = inlined_call_operand.hbm [shape: f32[2,3,4,4], index: 5, kind: output, shape index: {}]  }
   0x1   :  { %11 = vsyncpa [#allocation3], 0 }
   0x2   :  { %13 = vsyncpa [#allocation3 + $0x1], 0  ;;  %s2061_s18 = smov 0   ;;  %s2063_s19 = smov 0  }
   0x3   :  { %s2065_s20 = smov 0   ;;  %s2067_s21 = smov 0  }
   0x4   :  { %s2069_s22 = smov 0   ;;  %s2071_s23 = smov 0  }
   0x5 LB: > { %s1773_s24 = sadd.s32 4294967295, %s2019_s23   ;;  %s1774_s25 = sadd.s32 4294967294, %s2019_s23   ;;  %s2019_s23 = sphi %s2071_s23, %s19_s23   ;;  %s2015_s22 = sphi %s2069_s22, %s2660_s22   ;;  %s2011_s21 = sphi %s2067_s21, %s2659_s21   ;;  %s2007_s20 = sphi %s2065_s20, %s2658_s20   ;;  %s2003_s19 = sphi %s2063_s19, %s2657_s19   ;;  %s1999_s18 = sphi %s2061_s18, %s2656_s18  }
   0x6   : > { %s31_s26 = sadd.s32 1, %s2015_s22  ;;  %s166_s27 = sadd.s32 1, %s2007_s20 }
   0x7   : > { %p33_p0 = scmp.ge.s32.totalorder %s31_s26, 2  ;;  %p176_p1 = scmp.ne.s32.totalorder %s2007_s20, %s2003_s19 }
   0x8   : > { %p177_p2 = scmp.eq.s32.totalorder %s1773_s24, 1  ;;  %p182_p3 = scmp.ne.s32.totalorder %s2003_s19, %s1999_s18 }
   0x9   : > { %s2662_s26 = smov (%p33_p0, %s31_s26), 0  ;;  %p183_p5 = scmp.eq.s32.totalorder %s1774_s25, 1 }
   0xa   : > { %p2101_p4 = por %p177_p2, %p176_p1  ;;  %s161_s29 = ssub.s32 %s2015_s22, %s2662_s26 }
   0xb   : > { %p1775_p6 = scmp.ge.s32.totalorder %s2019_s23, 1  ;;  %p164_p7 = scmp.eq.s32.totalorder %s161_s29, 0 }
   0xc   : > { %p2108_p8 = por %p183_p5, %p182_p3  ;;  %p190_p9 = scmp.lt.s32.totalorder %s2019_s23, 3 }
   0xd   : > { %s2114_s6 = scalar_select %p164_p7, %s2007_s20, %s166_s27  }
   0xe   : > { %p191_p10 = pnand %p1775_p6, %p190_p9  ;;  %p1861_p11 = scmp.eq.s32.totalorder %s1773_s24, 0 }
   0xf   : > { %s202_s9 = sshll.u32 %s2644_s0, 4  ;;  %s2021_s10 = smov [#allocation2]   ;;  %s203_s9 = int_to_ptr.vmem [resolvable:$true] %s202_s9 }
  0x10   : > { %p1853_p12 = pneg %p191_p10  ;;  %252 = sbr.rel (%p191_p10) target bundleno = 497 (0x1f1), region = 40 }
  0x12   : > { %p1854_p13 = pnand %p1861_p11, %p1853_p12 }
  0x14   : > { %1856 = dma.vmem_to_smem (!%p1854_p13), %s203_s9, 32, %s2021_s10, [#allocation4]  }
  0x15   : > { %1990 = dma.done.wait (%p1861_p11), [#allocation4], 32  }
  0x16   : > { %1992 = vsyncadd (%p1861_p11), [#allocation4], 4294967264 }
  0x17   : > { %259 = sfence }
  0x18   : > { %p301_p0 = scmp.lt.s32.totalorder %s2011_s21, 1  ;;  %v346_v0 = vld [vmem:[%s2648_s4 + $0x8] sm:$0xff]  ;;  %v344_v5 = vld [vmem:[%s2647_s3] sm:$0xf]  ;;  %vm392_vm0 = vcmask 130048   ;;  %s2143_s7 = sshll.u32 %s2011_s21, 7 }
  0x19   : > { %433 = vmatpush.msra.mxu1 %v346_v0  ;;  %857 = vmatpush.msra.mxu3 %v346_v0  ;;  %v345_v8 = vld [vmem:[%s2648_s4] sm:$0xff]  ;;  %s328_s8 = sadd.s32 1, %s2143_s7  ;;  %s327_s9 = sld [smem:[#allocation2 + %s2143_s7]]  ;;  %v2022_v31 = vmov 683565275  }
  0x1a   : > { %s2124_s13 = scalar_select %p301_p0, %s2011_s21, 1  ;;  %v2023_v33 = vmov 2475754826   ;;  %v2024_v35 = vmov 2131351028  }
  0x1b   : > { %434 = vmatpush.msra.mxu1 %v345_v8  ;;  %858 = vmatpush.msra.mxu3 %v345_v8  ;;  %s329_s10 = sld [smem:[#allocation2 + %s328_s8]]  ;;  %v2025_v38 = vmov 2102212464   ;;  %v2026_v40 = vmov 920167782   ;;  %s330_s15 = sadd.s32 2, %s2143_s7 }
  0x1c   : > { %s1845_s14 = smul.u32 48, %s2124_s13  ;;  %v2027_v49 = vmov 1326507024   ;;  %s332_s16 = sadd.s32 3, %s2143_s7 }
  0x1d   : > { %1281 = vmatpush.msrb.mxu1 %v346_v0  ;;  %s1844_s11 = smul.u32 192, %s2124_s13  ;;  %s2207_s24 = sld [smem:[#allocation2 + %s332_s16]] }
  0x1e   : > { %s317_s17 = scalar_lea.vmem %s2646_s2, %s1845_s14  ;;  %s334_s25 = sadd.s32 4, %s2143_s7 }
  0x1f   : > { %v391_v1 = vld [vmem:[%s317_s17 + $0x8] sm:$0xff]  ;;  %v1810_v2 = vld [vmem:[%s317_s17 + $0x18] sm:$0xff]  ;;  %v390_v3 = vld [vmem:[%s317_s17] sm:$0xff]  ;;  %1282 = vmatpush.msrb.mxu1 %v345_v8  ;;  %v2164_v27 = vstv %s327_s9  ;;  %s2186_s14 = scalar_lea.vmem %s2645_s1, %s1844_s11  ;;  %s336_s27 = sadd.s32 5, %s2143_s7 }
  0x20   : > { %410 = vmatpush.msra.mxu0 %v391_v1  ;;  %834 = vmatpush.msra.mxu2 %v1810_v2  ;;  %v1809_v4 = vld [vmem:[%s317_s17 + $0x10] sm:$0xff]  ;;  %v1830_v6 = vld [vmem:[%s317_s17 + $0x28] sm:$0xff]  ;;  %v1829_v7 = vld [vmem:[%s317_s17 + $0x20] sm:$0xff]  ;;  %s2205_s17 = sld [smem:[#allocation2 + %s330_s15]]  ;;  %s338_s9 = sadd.s32 6, %s2143_s7 }
  0x21   : > { %v2166_v28 = vstv %s329_s10  ;;  %v347_v1 = vld [vmem:[%s2186_s14] sm:$0xf]  ;;  %v1784_v2 = vld [vmem:[%s2186_s14 + $0x4] sm:$0xf]  ;;  %s2250_s29 = sld [smem:[#allocation2 + %s334_s25]]  ;;  %s340_s11 = sadd.s32 7, %s2143_s7 }
  0x22   : > { %411 = vmatpush.msra.mxu0 %v390_v3  ;;  %835 = vmatpush.msra.mxu2 %v1809_v4  ;;  %s2259_s8 = sld [smem:[#allocation2 + %s336_s27]]  ;;  %s342_s13 = sadd.s32 8, %s2143_s7 }
  0x23   : > { %1792 = vmatmul.msk.f32.vlgmr.msra.gmra.mxu0 %vm392_vm0, %v344_v5  ;;  %1811 = vmatmul.msk.f32.vlgmr.msra.gmra.mxu2 %vm392_vm0, %v344_v5  ;;  %s2294_s10 = sld [smem:[#allocation2 + %s338_s9]]  ;;  %s298_s15 = sand.u32 1, %s2003_s19  }
  0x24   : > { %1258 = vmatpush.msrb.mxu0 %v1830_v6  ;;  %s2334_s12 = sld [smem:[#allocation2 + %s340_s11]]  ;;  %s1843_s16 = smul.u32 12, %s298_s15 }
  0x25   : > { %s2385_s7 = sld [smem:[#allocation2 + %s342_s13]]  ;;  %s1957_s13 = scalar_lea.hbm %s2649_s5, 24 }
  0x26   : > { %1259 = vmatpush.msrb.mxu0 %v1829_v7 }
  0x2b   : > { %1831 = vmatmul.msk.f32.vlgmr.msrb.gmra.mxu0 %vm392_vm0, %v344_v5 }
  0xa0   : > { %v413_v9 = vpop.f32.mrf.mxu0 }
  0xa1   : > { %1793 = vmatmul.msk.f32.vlgmr.msra.gmra.mxu1 %vm392_vm0, %v413_v9 }
  0xa6   : > { %v837_v10 = vpop.f32.mrf.mxu2 }
  0xa7   : > { %1812 = vmatmul.msk.f32.vlgmr.msra.gmra.mxu3 %vm392_vm0, %v837_v10 }
  0xa8   : > { %v1261_v11 = vpop.f32.mrf.mxu0 }
  0xa9   : > { %1832 = vmatmul.msk.f32.vlgmr.msrb.gmra.mxu1 %vm392_vm0, %v1261_v11 }
 0x11e   : > { %v2145_v12 = vpop.f32.mrf.mxu1 }
 0x11f   : > { %v2148_v13 = vmul.f32 1602.2123, %v2145_v12 }
 0x121   : > { %v440_v14 = vand.u32 2147483647, %v2148_v13  ;;  %v443_v15 = vand.u32 2139095040, %v2148_v13 }
 0x123   : > { %v444_v16 = vshrl.u32 %v443_v15, 23  ;;  %v447_v17 = vand.u32 8388607, %v440_v14 }
 0x125   : > { %v1794_v18 = vadd.s32 4294967169, %v444_v16  ;;  %v448_v19 = vor.u32 8388608, %v447_v17  ;;  %v2195_v16 = vmul.f32 %v2164_v27, %v347_v1  ;;  %v2198_v17 = vmul.f32 %v1784_v2, %v2166_v28 }
 0x126   : > { %v2156_v20 = vpop.f32.mrf.mxu1 }
 0x127   : > { %v450_v21 = vadd.s32 1, %v1794_v18  ;;  %v2159_v22 = vmul.f32 1602.2123, %v2156_v20  ;;  %v2161_v24 = vshll.u32 %v448_v19, 8 }
 0x129   : > { %vm451_vm1 = vcmp.gt.s32.totalorder %v450_v21, 0  ;;  %v1291_v25 = vand.u32 2139095040, %v2159_v22  ;;  %v489_v42 = vand.u32 65535, %v2161_v24  ;;  %v1288_v46 = vand.u32 2147483647, %v2159_v22 }
 0x12a   : > { %v452_v23 = vsel %vm451_vm1, %v450_v21, 0  ;;  %v490_v51 = vshrl.u32 %v2161_v24, 16 }
 0x12b   : > { %v454_v26 = vand.u32 31, %v452_v23  ;;  %v1292_v29 = vshrl.u32 %v1291_v25, 23  ;;  %v453_v37 = vshrl.u32 %v452_v23, 5  ;;  %v2190_v61 = vand.u32 8388607, %v1288_v46 }
 0x12d   : > { %v455_v30 = vsub.s32 32, %v454_v26  ;;  %v457_v32 = vshll.u32 %v2022_v31, %v454_v26  ;;  %v460_v34 = vshll.u32 %v2023_v33, %v454_v26  ;;  %v463_v36 = vshll.u32 %v2024_v35, %v454_v26 }
 0x12e   : > { %v466_v39 = vshll.u32 %v2025_v38, %v454_v26  ;;  %v469_v41 = vshll.u32 %v2026_v40, %v454_v26  ;;  %v1833_v55 = vadd.s32 4294967169, %v1292_v29  ;;  %vm472_vm2 = vcmp.lt.s32.totalorder %v453_v37, 1 }
 0x12f   : > { %v458_v43 = vshrl.u32 %v2023_v33, %v455_v30  ;;  %v461_v44 = vshrl.u32 %v2024_v35, %v455_v30  ;;  %v464_v45 = vshrl.u32 %v2025_v38, %v455_v30  ;;  %v456_v47 = vshrl.u32 %v2022_v31, %v455_v30 }
 0x130   : > { %v467_v48 = vshrl.u32 %v2026_v40, %v455_v30  ;;  %v470_v50 = vshrl.u32 %v2027_v49, %v455_v30  ;;  %vm475_vm3 = vcmp.lt.s32.totalorder %v453_v37, 4  ;;  %vm474_vm4 = vcmp.lt.s32.totalorder %v453_v37, 3 }
 0x131   : > { %v459_v52 = vor.u32 %v458_v43, %v457_v32  ;;  %v462_v53 = vor.u32 %v461_v44, %v460_v34  ;;  %v465_v54 = vor.u32 %v464_v45, %v463_v36  ;;  %v1298_v0 = vadd.s32 1, %v1833_v55 }
 0x132   : > { %v468_v56 = vor.u32 %v467_v48, %v466_v39  ;;  %v471_v57 = vor.u32 %v470_v50, %v469_v41  ;;  %vm473_vm5 = vcmp.lt.s32.totalorder %v453_v37, 2  ;;  %v1296_v18 = vor.u32 8388608, %v2190_v61 }
 0x133   : > { %v477_v58 = vsel %vm475_vm3, %v465_v54, 2102212464  ;;  %v480_v59 = vsel %vm472_vm2, %v459_v52, %v462_v53  ;;  %v484_v60 = vsel %vm472_vm2, %v462_v53, %v465_v54  ;;  %v476_v3 = vsel %vm472_vm2, %v456_v47, %v459_v52 }
 0x134   : > { %v481_v62 = vsel %vm475_vm3, %v468_v56, 920167782  ;;  %v485_v63 = vsel %vm475_vm3, %v471_v57, 1326507024  ;;  %v478_v6 = vsel %vm474_vm4, %v462_v53, %v477_v58  ;;  %vm1299_vm6 = vcmp.gt.s32.totalorder %v1298_v0, 0 }
 0x135   : > { %v482_v4 = vsel %vm474_vm4, %v465_v54, %v481_v62  ;;  %v486_v5 = vsel %vm474_vm4, %v468_v56, %v485_v63  ;;  %v2201_v19 = vsel %vm473_vm5, %v476_v3, %v478_v6  ;;  %v1300_v25 = vsel %vm1299_vm6, %v1298_v0, 0 }
 0x136   : > { %v483_v7 = vsel %vm473_vm5, %v480_v59, %v482_v4  ;;  %v487_v8 = vsel %vm473_vm5, %v484_v60, %v486_v5  ;;  %v1302_v50 = vand.u32 31, %v1300_v25  ;;  %v2028_v52 = vmov 0  }
 0x137   : > { %v491_v9 = vand.u32 65535, %v487_v8  ;;  %v492_v10 = vshrl.u32 %v487_v8, 16  ;;  %v513_v11 = vand.u32 65535, %v483_v7  ;;  %v514_v15 = vshrl.u32 %v483_v7, 16 }
 0x138   : > { %v2211_v56 = vsub.s32 32, %v1302_v50  ;;  %v2214_v59 = vshrl.u32 %v1300_v25, 5  ;;  %v1305_v0 = vshll.u32 %v2022_v31, %v1302_v50  ;;  %v1308_v3 = vshll.u32 %v2023_v33, %v1302_v50 }
 0x139   : > { %v494_v21 = vmul.u32 %v492_v10, %v489_v42  ;;  %v495_v23 = vmul.u32 %v491_v9, %v490_v51  ;;  %v493_v26 = vmul.u32 %v491_v9, %v489_v42  ;;  %v496_v29 = vmul.u32 %v492_v10, %v490_v51 }
 0x13a   : > { %v516_v30 = vmul.u32 %v514_v15, %v489_v42  ;;  %v517_v32 = vmul.u32 %v513_v11, %v490_v51  ;;  %v515_v37 = vmul.u32 %v513_v11, %v489_v42  ;;  %v518_v39 = vmul.u32 %v514_v15, %v490_v51 }
 0x13b   : > { %v497_v34 = vshll.u32 %v494_v21, 16  ;;  %v498_v36 = vshrl.u32 %v494_v21, 16  ;;  %v499_v41 = vshll.u32 %v495_v23, 16  ;;  %v500_v43 = vshrl.u32 %v495_v23, 16 }
 0x13c   : > { %v519_v44 = vshll.u32 %v516_v30, 16  ;;  %v520_v45 = vshrl.u32 %v516_v30, 16  ;;  %v521_v48 = vshll.u32 %v517_v32, 16  ;;  %v522_v54 = vshrl.u32 %v517_v32, 16 }
 0x13d   : > { %vm501_vm7 = vc.u32 %v493_v26, %v497_v34  ;;  %v503_v47 = vadd.s32 %v497_v34, %v493_v26  ;;  %v1306_v2 = vshrl.u32 %v2023_v33, %v2211_v56  ;;  %v1309_v4 = vshrl.u32 %v2024_v35, %v2211_v56 }
 0x13e   : > { %v502_v53 = vsel %vm501_vm7, 1, %v2028_v52  ;;  %vm523_vm8 = vc.u32 %v515_v37, %v519_v44  ;;  %v525_v55 = vadd.s32 %v519_v44, %v515_v37  ;;  %v1311_v6 = vshll.u32 %v2024_v35, %v1302_v50 }
 0x13f   : > { %v504_v42 = vadd.s32 %v502_v53, %v496_v29  ;;  %vm505_vm9 = vc.u32 %v503_v47, %v499_v41  ;;  %v524_v51 = vsel %vm523_vm8, 1, %v2028_v52  ;;  %v1312_v7 = vshrl.u32 %v2025_v38, %v2211_v56 }
 0x140   : > { %v506_v57 = vsel %vm505_vm9, 1, %v2028_v52  ;;  %v526_v58 = vadd.s32 %v524_v51, %v518_v39  ;;  %vm527_vm10 = vc.u32 %v525_v55, %v521_v48  ;;  %v2217_v63 = vadd.s32 %v525_v55, %v521_v48  ;;  %v1786_v55 = vld [vmem:[%s2186_s14 + $0x10] sm:$0xf] }
 0x141   : > { %v508_v60 = vadd.s32 %v506_v57, %v504_v42  ;;  %v528_v62 = vsel %vm527_vm10, 1, %v2028_v52  ;;  %v1314_v8 = vshll.u32 %v2025_v38, %v1302_v50  ;;  %v2230_v10 = vor.u32 %v1306_v2, %v1305_v0 }
 0x142   : > { %v530_v1 = vadd.s32 %v528_v62, %v526_v58  ;;  %v2232_v11 = vor.u32 %v1309_v4, %v1308_v3  ;;  %v1315_v15 = vshrl.u32 %v2026_v40, %v2211_v56  ;;  %v2239_v23 = vor.u32 %v1312_v7, %v1311_v6 }
 0x143   : > { %v509_v5 = vadd.s32 %v508_v60, %v498_v36  ;;  %v1317_v25 = vshll.u32 %v2026_v40, %v1302_v50  ;;  %v1318_v26 = vshrl.u32 %v2027_v49, %v2211_v56  ;;  %v2245_v29 = vstv %s2205_s17  ;;  %v2292_v60 = vpop.f32.mrf.mxu3  ;;  %s2541_s17 = scalar_lea.vmem [#allocation5], %s1843_s16 }
 0x144   : > { %v531_v9 = vadd.s32 %v530_v1, %v520_v45  ;;  %v2248_v30 = vstv %s2207_s24  ;;  %v1316_v34 = vor.u32 %v1315_v15, %v1314_v8  ;;  %vm1320_vm12 = vcmp.lt.s32.totalorder %v2214_v59, 1  ;;  %s1846_s24 = smul.u32 12, %s2011_s21  ;;  %s1644_s21 = sshll.u32 %s2541_s17, 4  ;;  %s1645_s21 = int_to_ptr.vmem [resolvable:$true] %s1644_s21 }
 0x145   : > { %v2237_v21 = vadd.s32 %v509_v5, %v500_v43  ;;  %v1319_v36 = vor.u32 %v1318_v26, %v1317_v25  ;;  %v2257_v37 = vshll.u32 %v1296_v18, 8  ;;  %v533_v39 = vmul.u32 %v2161_v24, %v2201_v19  ;;  %v1785_v19 = vld [vmem:[%s2186_s14 + $0x8] sm:$0xf]  ;;  %v1787_v26 = vld [vmem:[%s2186_s14 + $0x14] sm:$0xf] }
 0x146   : > { %v532_v32 = vadd.s32 %v531_v9, %v522_v54  ;;  %vm1323_vm13 = vcmp.lt.s32.totalorder %v2214_v59, 4  ;;  %v1328_v43 = vsel %vm1320_vm12, %v2230_v10, %v2232_v11  ;;  %vm1322_vm14 = vcmp.lt.s32.totalorder %v2214_v59, 3 }
 0x147   : > { %vm535_vm11 = vc.u32 %v2237_v21, %v2217_v63  ;;  %v1329_v61 = vsel %vm1323_vm13, %v1316_v34, 920167782  ;;  %v1332_v18 = vsel %vm1320_vm12, %v2232_v11, %v2239_v23  ;;  %v1333_v24 = vsel %vm1323_vm13, %v1319_v36, 1326507024 }
 0x148   : > { %v536_v41 = vadd.s32 1, %v532_v32  ;;  %vm1321_vm15 = vcmp.lt.s32.totalorder %v2214_v59, 2  ;;  %v1330_v45 = vsel %vm1322_vm14, %v2239_v23, %v1329_v61  ;;  %v1334_v47 = vsel %vm1322_vm14, %v1316_v34, %v1333_v24 }
 0x149   : > { %v1331_v50 = vsel %vm1321_vm15, %v1328_v43, %v1330_v45  ;;  %v1335_v53 = vsel %vm1321_vm15, %v1332_v18, %v1334_v47  ;;  %v1337_v54 = vand.u32 65535, %v2257_v37  ;;  %v1338_v42 = vshrl.u32 %v2257_v37, 16 }
 0x14a   : > { %v537_v44 = vsel %vm535_vm11, %v536_v41, %v532_v32  ;;  %v1339_v51 = vand.u32 65535, %v1335_v53  ;;  %v1340_v57 = vshrl.u32 %v1335_v53, 16  ;;  %v1362_v58 = vshrl.u32 %v1331_v50, 16 }
 0x14b   : > { %v538_v48 = vadd.s32 %v537_v44, %v533_v39  ;;  %v354_v62 = vadd.f32 %v2198_v17, %v2195_v16  ;;  %v358_v0 = vmul.f32 %v1785_v19, %v2245_v29  ;;  %v1361_v4 = vand.u32 65535, %v1331_v50 }
 0x14c   : > { %v1342_v2 = vmul.u32 %v1340_v57, %v1337_v54  ;;  %v2299_v3 = vmul.u32 %v1339_v51, %v1338_v42  ;;  %v363_v5 = vmul.f32 %v1786_v55, %v2248_v30  ;;  %v1364_v7 = vmul.u32 %v1362_v58, %v1337_v54 }
 0x14d   : > { %v539_v1 = vadd.s32 536870912, %v538_v48  ;;  %v2305_v8 = vmul.f32 1602.2123, %v2292_v60  ;;  %v2308_v9 = vstv %s2250_s29  ;;  %v2311_v15 = vstv %s2259_s8  ;;  %s1643_s29 = scalar_lea.hbm %s2649_s5, %s1846_s24  ;;  %s1631_s8 = scalar_lea.sflag [#allocation3], %s298_s15 }
 0x14e   : > { %v1341_v16 = vmul.u32 %v1339_v51, %v1337_v54  ;;  %v1345_v17 = vshll.u32 %v1342_v2, 16  ;;  %v359_v25 = vadd.f32 %v358_v0, %v354_v62  ;;  %v1344_v34 = vmul.u32 %v1340_v57, %v1338_v42 }
 0x14f   : > { %v2302_v6 = vshrl.u32 %v539_v1, 30  ;;  %v1367_v36 = vshll.u32 %v1364_v7, 16  ;;  %v1347_v39 = vshll.u32 %v2299_v3, 16  ;;  %v1363_v43 = vmul.u32 %v1361_v4, %v1337_v54  ;;  %v1789_v54 = vld [vmem:[%s2186_s14 + $0x20] sm:$0xf] }
 0x150   : > { %vm1349_vm0 = vc.u32 %v1341_v16, %v1345_v17  ;;  %v1351_v41 = vadd.s32 %v1345_v17, %v1341_v16  ;;  %v1365_v24 = vmul.u32 %v1361_v4, %v1338_v42  ;;  %v867_v19 = vand.u32 2139095040, %v2305_v8 }
 0x151   : > { %v541_v32 = vshll.u32 %v2302_v6, 30  ;;  %v1350_v18 = vsel %vm1349_vm0, 1, %v2028_v52  ;;  %v368_v44 = vmul.f32 %v1787_v26, %v2308_v9  ;;  %vm1371_vm2 = vc.u32 %v1363_v43, %v1367_v36 }
 0x152   : > { %v1352_v45 = vadd.s32 %v1350_v18, %v1344_v34  ;;  %vm1353_vm1 = vc.u32 %v1351_v41, %v1347_v39  ;;  %v364_v47 = vadd.f32 %v363_v5, %v359_v25  ;;  %v2323_v50 = vstv %s2294_s10 }
 0x153   : > { %v2316_v61 = vsub.s32 %v538_v48, %v541_v32  ;;  %v1788_v48 = vld [vmem:[%s2186_s14 + $0x18] sm:$0xf]  ;;  %v1354_v55 = vsel %vm1353_vm1, 1, %v2028_v52  ;;  %v1366_v51 = vmul.u32 %v1362_v58, %v1338_v42  ;;  %v1372_v57 = vsel %vm1371_vm2, 1, %v2028_v52 }
 0x154   : > { %v1373_v62 = vadd.s32 %v1367_v36, %v1363_v43  ;;  %v1304_v1 = vshrl.u32 %v2022_v31, %v2211_v56  ;;  %v1369_v4 = vshll.u32 %v1365_v24, 16  ;;  %v868_v5 = vshrl.u32 %v867_v19, 23 }
 0x155   : > { %vm543_vm3 = vcmp.lt.s32.totalorder %v2316_v61, 0  ;;  %v544_v53 = vsub.s32 0, %v2316_v61  ;;  %v1346_v17 = vshrl.u32 %v1342_v2, 16  ;;  %v1356_v25 = vadd.s32 %v1354_v55, %v1352_v45 }
 0x156   : > { %v1374_v26 = vadd.s32 %v1372_v57, %v1366_v51  ;;  %v373_v32 = vmul.f32 %v1788_v48, %v2311_v15  ;;  %v2338_v42 = vmul.f32 %v1789_v54, %v2323_v50  ;;  %v1325_v58 = vsel %vm1323_vm13, %v2239_v23, 2102212464 }
 0x157   : > { %v545_v0 = vsel %vm543_vm3, %v544_v53, %v2316_v61  ;;  %vm1375_vm4 = vc.u32 %v1373_v62, %v1369_v4  ;;  %v1348_v56 = vshrl.u32 %v2299_v3, 16  ;;  %v1357_v36 = vadd.s32 %v1356_v25, %v1346_v17 }
 0x158   : > { %v546_v16 = vclz %v545_v0  ;;  %v1376_v2 = vsel %vm1375_vm4, 1, %v2028_v52  ;;  %v369_v39 = vadd.f32 %v368_v44, %v364_v47  ;;  %v1368_v41 = vshrl.u32 %v1364_v7, 16 }
 0x159   : > { %v1378_v43 = vadd.s32 %v1376_v2, %v1374_v26  ;;  %v1813_v18 = vadd.s32 4294967169, %v868_v5  ;;  %v1324_v19 = vsel %vm1320_vm12, %v1304_v1, %v2230_v10  ;;  %v1326_v23 = vsel %vm1322_vm14, %v2232_v11, %v1325_v58 }
 0x15a   : > { %v1795_v34 = vadd.s32 4294967294, %v546_v16  ;;  %v2351_v45 = vadd.s32 %v1357_v36, %v1348_v56  ;;  %v1370_v3 = vshrl.u32 %v1365_v24, 16  ;;  %v534_v7 = vadd.s32 %v2217_v63, %v2237_v21 }
 0x15b   : > { %v1379_v48 = vadd.s32 %v1378_v43, %v1368_v41  ;;  %v874_v54 = vadd.s32 1, %v1813_v18  ;;  %v2355_v55 = vadd.s32 %v1373_v62, %v1369_v4  ;;  %v1327_v51 = vsel %vm1321_vm15, %v1324_v19, %v1326_v23 }
 0x15c   : > { %vm1796_vm5 = vcmp.lt.s32.totalorder %v1795_v34, 0  ;;  %v374_v1 = vadd.f32 %v373_v32, %v369_v39  ;;  %v2363_v63 = vstv %s2334_s12  ;;  %v864_v59 = vand.u32 2147483647, %v2305_v8 }
 0x15d   : > { %v549_v53 = vsel %vm1796_vm5, 0, %v1795_v34  ;;  %v1380_v11 = vadd.s32 %v1379_v48, %v1370_v3  ;;  %vm875_vm6 = vcmp.gt.s32.totalorder %v874_v54, 0  ;;  %vm1383_vm7 = vc.u32 %v2351_v45, %v2355_v55 }
 0x15e   : > { %v550_v44 = vsub.s32 32, %v549_v53  ;;  %v554_v47 = vsub.s32 4294967266, %v549_v53  ;;  %v551_v10 = vshll.u32 %v2316_v61, %v549_v53  ;;  %v876_v24 = vsel %vm875_vm6, %v874_v54, 0 }
 0x15f   : > { %v1384_v21 = vadd.s32 1, %v1380_v11  ;;  %v878_v62 = vand.u32 31, %v876_v24  ;;  %v1381_v61 = vmul.u32 %v2257_v37, %v1327_v51  ;;  %vm442_vm8 = vcmp.lt.s32.totalorder %v2148_v13, 0 }
 0x160   : > { %v552_v57 = vshrl.u32 %v534_v7, %v550_v44  ;;  %v555_v0 = vadd.s32 127, %v554_v47  ;;  %v2368_v17 = vshrl.u32 %v876_v24, 5  ;;  %vm2374_vm9 = vcmp.le.f32.partialorder %v440_v14, 0.7853982 }
 0x161   : > { %v1385_v16 = vsel %vm1383_vm7, %v1384_v21, %v1380_v11  ;;  %v879_v25 = vsub.s32 32, %v878_v62  ;;  %v881_v26 = vshll.u32 %v2022_v31, %v878_v62  ;;  %v884_v56 = vshll.u32 %v2023_v33, %v878_v62 }
 0x162   : > { %v553_v4 = vor.u32 %v552_v57, %v551_v10  ;;  %v556_v5 = vshll.u32 %v555_v0, 23  ;;  %v1386_v37 = vadd.s32 %v1385_v16, %v1381_v61  ;;  %v887_v39 = vshll.u32 %v2024_v35, %v878_v62 }
 0x163   : > { %v882_v36 = vshrl.u32 %v2023_v33, %v879_v25  ;;  %v885_v2 = vshrl.u32 %v2024_v35, %v879_v25  ;;  %v888_v41 = vshrl.u32 %v2025_v38, %v879_v25  ;;  %v890_v14 = vshll.u32 %v2025_v38, %v878_v62 }
 0x164   : > { %v557_v58 = vor.u32 4788187, %v556_v5  ;;  %v560_v34 = vcvt.s32.f32 %v553_v4  ;;  %v1387_v18 = vadd.s32 536870912, %v1386_v37  ;;  %v891_v19 = vshrl.u32 %v2026_v40, %v879_v25 }
 0x165   : > { %v883_v23 = vor.u32 %v882_v36, %v881_v26  ;;  %v886_v53 = vor.u32 %v885_v2, %v884_v56  ;;  %v889_v3 = vor.u32 %v888_v41, %v887_v39  ;;  %v893_v33 = vshll.u32 %v2026_v40, %v878_v62  ;;  %v1790_v40 = vld [vmem:[%s2186_s14 + $0x24] sm:$0xf] }
 0x166   : > { %v558_v43 = vand.u32 2147483647, %v557_v58  ;;  %v2388_v54 = vshrl.u32 %v1387_v18, 30  ;;  %v892_v35 = vor.u32 %v891_v19, %v890_v14  ;;  %v894_v7 = vshrl.u32 %v2027_v49, %v879_v25  ;;  %v1791_v58 = vld [vmem:[%s2186_s14 + $0x28] sm:$0xf] }
 0x167   : > { %v564_v44 = vsub.s32 4, %v2302_v6  ;;  %v880_v38 = vshrl.u32 %v2022_v31, %v879_v25  ;;  %vm896_vm10 = vcmp.lt.s32.totalorder %v2368_v17, 1  ;;  %vm898_vm11 = vcmp.lt.s32.totalorder %v2368_v17, 3 }
 0x168   : > { %v561_v48 = vmul.f32 %v560_v34, %v558_v43  ;;  %v1389_v10 = vshll.u32 %v2388_v54, 30  ;;  %v895_v51 = vor.u32 %v894_v7, %v893_v33  ;;  %vm899_vm12 = vcmp.lt.s32.totalorder %v2368_v17, 4 }
 0x169   : > { %v900_v11 = vsel %vm896_vm10, %v880_v38, %v883_v23  ;;  %v901_v49 = vsel %vm899_vm12, %v889_v3, 2102212464  ;;  %v904_v31 = vsel %vm896_vm10, %v883_v23, %v886_v53  ;;  %v905_v57 = vsel %vm899_vm12, %v892_v35, 920167782 }
 0x16a   : > { %v562_v47 = vxor.u32 2147483648, %v561_v48  ;;  %v2408_v24 = vsub.s32 %v1386_v37, %v1389_v10  ;;  %vm897_vm13 = vcmp.lt.s32.totalorder %v2368_v17, 2  ;;  %v902_v21 = vsel %vm898_vm11, %v886_v53, %v901_v49 }
 0x16b   : > { %v565_v62 = vsel %vm442_vm8, %v564_v44, %v2302_v6  ;;  %v2421_v5 = vsel %vm897_vm13, %v900_v11, %v902_v21  ;;  %v906_v61 = vsel %vm898_vm11, %v889_v3, %v905_v57  ;;  %v379_v16 = vadd.f32 %v2338_v42, %v374_v1 }
 0x16c   : > { %v563_v0 = vsel %vm442_vm8, %v562_v47, %v561_v48  ;;  %v383_v25 = vmul.f32 %v1790_v40, %v2363_v63  ;;  %vm1391_vm14 = vcmp.lt.s32.totalorder %v2408_v24, 0  ;;  %v2430_v6 = vstv %s2385_s7 }
 0x16d   : > { %v566_v4 = vsel %vm2374_vm9, %v2148_v13, %v563_v0  ;;  %v1392_v34 = vsub.s32 0, %v2408_v24  ;;  %v2435_v37 = vsel %vm897_vm13, %v904_v31, %v906_v61  ;;  %v567_v56 = vsel %vm2374_vm9, 0, %v565_v62 }
 0x16e   : > { %v568_v26 = vmul.f32 %v566_v4, %v566_v4  ;;  %v871_v1 = vand.u32 8388607, %v864_v59  ;;  %v384_v39 = vadd.f32 %v383_v25, %v379_v16  ;;  %v388_v41 = vmul.f32 %v1791_v58, %v2430_v6 }
 0x16f   : > { %v1393_v42 = vsel %vm1391_vm14, %v1392_v34, %v2408_v24  ;;  %v584_v14 = vadd.s32 3, %v567_v56  ;;  %v739_v48 = vand.u32 3, %v567_v56  ;;  %v908_v44 = vsel %vm896_vm10, %v886_v53, %v889_v3 }
 0x170   : > { %v569_v36 = vmul.f32 -0.001358992, %v568_v26  ;;  %v576_v2 = vmul.f32 -0.00019511016, %v568_v26  ;;  %v1394_v19 = vclz %v1393_v42  ;;  %v872_v32 = vor.u32 8388608, %v871_v1 }
 0x171   : > { %v909_v38 = vsel %vm899_vm12, %v895_v51, 1326507024  ;;  %v2447_v47 = vadd.f32 %v388_v41, %v384_v39  ;;  %vm1290_vm15 = vcmp.lt.s32.totalorder %v2159_v22, 0  ;;  %v585_v11 = vand.u32 3, %v584_v14  ;;  %v1820_v14 = vld [vmem:[%s2186_s14 + $0x80] sm:$0xf] }
 0x172   : > { %v570_v43 = vadd.f32 0.041655596, %v569_v36  ;;  %v577_v18 = vadd.f32 0.008332121, %v576_v2  ;;  %v1834_v7 = vadd.s32 4294967294, %v1394_v19  ;;  %v910_v53 = vsel %vm898_vm11, %v892_v35, %v909_v38 }
 0x173   : > { %vm2452_vm0 = vcmp.le.f32.partialorder %v1288_v46, 0.7853982  ;;  %vm740_vm2 = vcmp.lt.s32.totalorder %v739_v48, 2  ;;  %v1412_v51 = vsub.s32 4, %v2388_v54  ;;  %vm583_vm3 = vweird.f32 %v2148_v13 }
 0x174   : > { %v571_v23 = vmul.f32 %v570_v43, %v568_v26  ;;  %v578_v33 = vmul.f32 %v577_v18, %v568_v26  ;;  %vm1835_vm1 = vcmp.lt.s32.totalorder %v1834_v7, 0  ;;  %vm741_vm4 = vcmp.eq.s32.totalorder %v739_v48, 0 }
 0x175   : > { %vm744_vm5 = vcmp.eq.s32.totalorder %v739_v48, 2  ;;  %v1397_v57 = vsel %vm1835_vm1, 0, %v1834_v7  ;;  %v2460_v0 = vshll.u32 %v872_v32, 8  ;;  %v1382_v62 = vadd.s32 %v2355_v55, %v2351_v45 }
 0x176   : > { %v572_v10 = vadd.f32 -0.4999988, %v571_v23  ;;  %v579_v40 = vadd.f32 -0.16666654, %v578_v33  ;;  %v1398_v61 = vsub.s32 32, %v1397_v57  ;;  %vm586_vm6 = vcmp.lt.s32.totalorder %v585_v11, 2 }
 0x177   : > { %vm587_vm7 = vcmp.eq.s32.totalorder %v585_v11, 0  ;;  %v1402_v35 = vsub.s32 4294967266, %v1397_v57  ;;  %v911_v16 = vsel %vm897_vm13, %v908_v44, %v910_v53  ;;  %v1413_v34 = vsel %vm1290_vm15, %v1412_v51, %v2388_v54  ;;  %v1821_v33 = vld [vmem:[%s2186_s14 + $0x84] sm:$0xf] }
 0x178   : > { %v573_v3 = vmul.f32 %v572_v10, %v568_v26  ;;  %v580_v31 = vmul.f32 %v579_v40, %v568_v26  ;;  %v1400_v58 = vshrl.u32 %v1382_v62, %v1398_v61  ;;  %v2470_v36 = vand.u32 65535, %v2460_v0 }
 0x179   : > { %v1403_v56 = vadd.s32 127, %v1402_v35  ;;  %v915_v45 = vand.u32 65535, %v911_v16  ;;  %v916_v55 = vshrl.u32 %v911_v16, 16  ;;  %vm590_vm8 = vcmp.eq.s32.totalorder %v585_v11, 2 }
 0x17a   : > { %v574_v46 = vadd.f32 1.0, %v573_v3  ;;  %v581_v21 = vadd.f32 1.0, %v580_v31  ;;  %v1399_v17 = vshll.u32 %v2408_v24, %v1397_v57  ;;  %v1415_v54 = vsel %vm2452_vm0, 0, %v1413_v34 }
 0x17b   : > { %v1404_v1 = vshll.u32 %v1403_v56, 23  ;;  %v2479_v39 = vmul.u32 %v916_v55, %v2470_v36  ;;  %v917_v32 = vmul.u32 %v915_v45, %v2470_v36  ;;  %v1208_v48 = vmul.f32 %v1820_v14, %v2164_v27  ;;  %v1822_v14 = vld [vmem:[%s2186_s14 + $0x88] sm:$0xf] }
 0x17c   : > { %v582_v25 = vmul.f32 %v581_v21, %v566_v4  ;;  %v591_v26 = vxor.u32 2147483648, %v574_v46  ;;  %v2474_v4 = vshrl.u32 %v2460_v0, 16  ;;  %v1401_v19 = vor.u32 %v1400_v58, %v1399_v17 }
 0x17d   : > { %v1405_v7 = vor.u32 4788187, %v1404_v1  ;;  %v921_v40 = vshll.u32 %v2479_v39, 16  ;;  %v1211_v31 = vmul.f32 %v1821_v33, %v2166_v28  ;;  %v2499_v62 = vadd.s32 3, %v1415_v54 }
 0x17e   : > { %v588_v2 = vxor.u32 2147483648, %v582_v25  ;;  %v592_v42 = vsel %vm590_vm8, %v591_v26, %v582_v25  ;;  %v746_v18 = vsel %vm744_vm5, %v591_v26, %v582_v25  ;;  %v2494_v10 = vmul.u32 %v915_v45, %v2474_v4 }
 0x17f   : > { %v1406_v51 = vand.u32 2147483647, %v1405_v7  ;;  %v1408_v57 = vcvt.s32.f32 %v1401_v19  ;;  %vm925_vm9 = vc.u32 %v917_v32, %v921_v40  ;;  %v938_v13 = vshrl.u32 %v2435_v37, 16 }
 0x180   : > { %v589_v41 = vsel %vm587_vm7, %v574_v46, %v588_v2  ;;  %v743_v43 = vsel %vm741_vm4, %v574_v46, %v588_v2  ;;  %v923_v35 = vshll.u32 %v2494_v10, 16  ;;  %v926_v16 = vsel %vm925_vm9, 1, %v2028_v52 }
 0x181   : > { %v593_v24 = vsel %vm586_vm6, %v589_v41, %v592_v42  ;;  %v747_v23 = vsel %vm740_vm2, %v743_v43, %v746_v18  ;;  %v1409_v61 = vmul.f32 %v1408_v57, %v1406_v51  ;;  %v927_v25 = vadd.s32 %v921_v40, %v917_v32 }
 0x182   : > { %v594_v44 = vsel %vm583_vm3, nan, %v593_v24  ;;  %v748_v38 = vsel %vm583_vm3, nan, %v747_v23  ;;  %v920_v56 = vmul.u32 %v916_v55, %v2474_v4  ;;  %v2505_v17 = vand.u32 3, %v1415_v54 }
 0x183   : > { %v751_v53 = vmul.f32 %v748_v38, %v594_v44  ;;  %v753_v11 = vmul.f32 %v748_v38, %v748_v38  ;;  %v754_v3 = vmul.f32 %v594_v44, %v594_v44  ;;  %v1410_v2 = vxor.u32 2147483648, %v1409_v61 }
 0x184   : > { %vm929_vm10 = vc.u32 %v927_v25, %v923_v35  ;;  %v749_v42 = vmul.f32 0.0012482741, %v594_v44  ;;  %v928_v41 = vadd.s32 %v926_v16, %v920_v56  ;;  %v937_v43 = vand.u32 65535, %v2435_v37 }
 0x185   : > { %v752_v46 = vadd.f32 %v751_v53, %v751_v53  ;;  %v755_v21 = vsub.f32 %v753_v11, %v754_v3  ;;  %v1411_v19 = vsel %vm1290_vm15, %v1410_v2, %v1409_v61  ;;  %v930_v24 = vsel %vm929_vm10, 1, %v2028_v52 }
 0x186   : > { %v2513_v23 = vmul.u32 %v938_v13, %v2470_v36  ;;  %v2518_v7 = vsel %vm2452_vm0, %v2159_v22, %v1411_v19  ;;  %v1212_v40 = vadd.f32 %v1211_v31, %v1208_v48  ;;  %v750_v11 = vsub.f32 %v2145_v12, %v749_v42 }
 0x187   : > { %v758_v26 = vmul.f32 %v752_v46, %v748_v38  ;;  %v759_v58 = vmul.f32 %v755_v21, %v594_v44  ;;  %v761_v34 = vmul.f32 %v755_v21, %v748_v38  ;;  %v762_v45 = vmul.f32 %v752_v46, %v594_v44 }
 0x188   : > { %v756_v55 = vmul.f32 0.00062413706, %v752_v46  ;;  %v1416_v53 = vmul.f32 %v2518_v7, %v2518_v7  ;;  %v1215_v51 = vmul.f32 %v1822_v14, %v2245_v29  ;;  %v932_v57 = vadd.s32 %v930_v24, %v928_v41 }
 0x189   : > { %v760_v1 = vadd.f32 %v759_v58, %v758_v26  ;;  %v763_v18 = vsub.f32 %v761_v34, %v762_v45  ;;  %v922_v16 = vshrl.u32 %v2479_v39, 16  ;;  %v941_v48 = vmul.u32 %v937_v43, %v2474_v4 }
 0x18a   : > { %v1417_v61 = vmul.f32 -0.001358992, %v1416_v53  ;;  %v1424_v49 = vmul.f32 -0.00019511016, %v1416_v53  ;;  %v757_v35 = vadd.f32 %v756_v55, %v750_v11  ;;  %v943_v31 = vshll.u32 %v2513_v23, 16 }
 0x18b   : > { %v766_v33 = vmul.f32 %v760_v1, %v748_v38  ;;  %v770_v54 = vmul.f32 %v760_v1, %v594_v44  ;;  %v767_v32 = vmul.f32 %v763_v18, %v594_v44  ;;  %v769_v37 = vmul.f32 %v763_v18, %v748_v38 }
 0x18c   : > { %v764_v3 = vmul.f32 -0.00041609135, %v760_v1  ;;  %v1418_v58 = vadd.f32 0.041655596, %v1417_v61  ;;  %v1216_v56 = vadd.f32 %v1215_v51, %v1212_v40  ;;  %v1425_v45 = vadd.f32 0.008332121, %v1424_v49 }
 0x18d   : > { %v768_v46 = vadd.f32 %v767_v32, %v766_v33  ;;  %v771_v21 = vsub.f32 %v769_v37, %v770_v54  ;;  %v933_v2 = vadd.s32 %v932_v57, %v922_v16  ;;  %v1823_v1 = vld [vmem:[%s2186_s14 + $0x90] sm:$0xf]  ;;  %v924_v18 = vshrl.u32 %v2494_v10, 16 }
 0x18e   : > { %v765_v34 = vadd.f32 %v764_v3, %v757_v35  ;;  %v1419_v41 = vmul.f32 %v1418_v58, %v1416_v53  ;;  %v939_v39 = vmul.u32 %v937_v43, %v2470_v36  ;;  %v1426_v19 = vmul.f32 %v1425_v45, %v1416_v53 }
 0x18f   : > { %v772_v25 = vmul.f32 0.00031206853, %v768_v46  ;;  %v774_v26 = vmul.f32 %v768_v46, %v748_v38  ;;  %v775_v12 = vmul.f32 %v771_v21, %v594_v44  ;;  %v942_v38 = vmul.u32 %v938_v13, %v2474_v4  ;;  %v1824_v21 = vld [vmem:[%s2186_s14 + $0x94] sm:$0xf] }
 0x190   : > { %v945_v44 = vshll.u32 %v941_v48, 16  ;;  %v1420_v55 = vadd.f32 -0.4999988, %v1419_v41  ;;  %vm947_vm11 = vc.u32 %v939_v39, %v943_v31  ;;  %v949_v33 = vadd.s32 %v943_v31, %v939_v39 }
 0x191   : > { %v776_v42 = vadd.f32 %v775_v12, %v774_v26  ;;  %v773_v14 = vadd.f32 %v772_v25, %v765_v34  ;;  %v1219_v54 = vmul.f32 %v1823_v1, %v2248_v30  ;;  %v1427_v32 = vadd.f32 -0.16666654, %v1426_v19 }
 0x192   : > { %v934_v37 = vadd.s32 %v933_v2, %v924_v18  ;;  %v948_v10 = vsel %vm947_vm11, 1, %v2028_v52  ;;  %v1421_v36 = vmul.f32 %v1420_v55, %v1416_v53  ;;  %vm951_vm12 = vc.u32 %v949_v33, %v945_v44 }
 0x193   : > { %v777_v24 = vmul.f32 -0.0002496548, %v776_v42  ;;  %v950_v43 = vadd.s32 %v948_v10, %v942_v38  ;;  %vm780_vm13 = vcmask 27648   ;;  %v1428_v11 = vmul.f32 %v1427_v32, %v1416_v53  ;;  %v1826_v38 = vld [vmem:[%s2186_s14 + $0xa0] sm:$0xf] }
 0x194   : > { %v944_v4 = vshrl.u32 %v2513_v23, 16  ;;  %v952_v13 = vsel %vm951_vm12, 1, %v2028_v52  ;;  %v1422_v51 = vadd.f32 1.0, %v1421_v36  ;;  %v953_v57 = vadd.s32 %v949_v33, %v945_v44  ;;  %v1827_v32 = vld [vmem:[%s2186_s14 + $0xa4] sm:$0xf] }
 0x195   : > { %v778_v40 = vadd.f32 %v777_v24, %v773_v14  ;;  %v954_v46 = vadd.s32 %v952_v13, %v950_v43  ;;  %v1429_v61 = vadd.f32 1.0, %v1428_v11  ;;  %v1433_v49 = vand.u32 3, %v2499_v62 }
 0x196   : > { %v946_v53 = vshrl.u32 %v941_v48, 16  ;;  %v2545_v23 = vadd.s32 %v953_v57, %v934_v37  ;;  %vm959_vm14 = vc.u32 %v934_v37, %v953_v57  ;;  %vm1431_vm15 = vweird.f32 %v2159_v22  ;;  %v1825_v48 = vld [vmem:[%s2186_s14 + $0x98] sm:$0xf] }
 0x197   : > { %v779_v3 = vadd.f32 %v778_v40, %v2447_v47  ;;  %v955_v35 = vadd.s32 %v954_v46, %v944_v4  ;;  %v1430_v52 = vmul.f32 %v1429_v61, %v2518_v7  ;;  %v1439_v47 = vxor.u32 2147483648, %v1422_v51  ;;  %v1828_v61 = vld [vmem:[%s2186_s14 + $0xa8] sm:$0xf] }
 0x198   : > { %v1220_v16 = vadd.f32 %v1219_v54, %v1216_v56  ;;  %v1223_v31 = vmul.f32 %v1824_v21, %v2308_v9  ;;  %vm1588_vm0 = vcmp.lt.s32.totalorder %v2505_v17, 2  ;;  %vm1434_vm1 = vcmp.lt.s32.totalorder %v1433_v49, 2 }
 0x199   : > { %781 = vst.msk [vmem:[%s2541_s17] sm:$0xf] %vm780_vm13, %v779_v3  ;;  %v956_v62 = vadd.s32 %v955_v35, %v946_v53  ;;  %vm1435_vm2 = vcmp.eq.s32.totalorder %v1433_v49, 0  ;;  %v1436_v25 = vxor.u32 2147483648, %v1430_v52  ;;  %vm1589_vm3 = vcmp.eq.s32.totalorder %v2505_v17, 0 }
 0x19a   : > { %vm1438_vm4 = vcmp.eq.s32.totalorder %v1433_v49, 2  ;;  %vm1592_vm5 = vcmp.eq.s32.totalorder %v2505_v17, 2  ;;  %v957_v7 = vmul.u32 %v2460_v0, %v2421_v5  ;;  %v1224_v45 = vadd.f32 %v1223_v31, %v1220_v16 }
 0x19b   : > { %v960_v26 = vadd.s32 1, %v956_v62  ;;  %v1437_v12 = vsel %vm1435_vm2, %v1422_v51, %v1436_v25  ;;  %v1440_v58 = vsel %vm1438_vm4, %v1439_v47, %v1430_v52  ;;  %v1591_v34 = vsel %vm1589_vm3, %v1422_v51, %v1436_v25 }
 0x19c   : > { %v1594_v56 = vsel %vm1592_vm5, %v1439_v47, %v1430_v52  ;;  %v1441_v2 = vsel %vm1434_vm1, %v1437_v12, %v1440_v58  ;;  %v1227_v41 = vmul.f32 %v1825_v48, %v2311_v15  ;;  %v1231_v54 = vmul.f32 %v1826_v38, %v2323_v50 }
 0x19d   : > { %v1595_v42 = vsel %vm1588_vm0, %v1591_v34, %v1594_v56  ;;  %v961_v1 = vsel %vm959_vm14, %v960_v26, %v956_v62  ;;  %v1442_v18 = vsel %vm1431_vm15, nan, %v1441_v2  ;;  %v1235_v4 = vmul.f32 %v1827_v32, %v2363_v63 }
 0x19e   : > { %v1596_v5 = vsel %vm1431_vm15, nan, %v1595_v42  ;;  %v962_v0 = vadd.s32 %v961_v1, %v957_v7  ;;  %v1602_v19 = vmul.f32 %v1442_v18, %v1442_v18  ;;  %v1228_v55 = vadd.f32 %v1227_v41, %v1224_v45 }
 0x19f   : > { %v1599_v39 = vmul.f32 %v1596_v5, %v1442_v18  ;;  %v1601_v14 = vmul.f32 %v1596_v5, %v1596_v5  ;;  %v1597_v43 = vmul.f32 0.0012482741, %v1442_v18  ;;  %v1239_v48 = vmul.f32 %v1828_v61, %v2430_v6  ;;  %v1802_v61 = vld [vmem:[%s2186_s14 + $0x48] sm:$0xf] }
 0x1a0   : > { %v963_v44 = vadd.s32 536870912, %v962_v0  ;;  %v1232_v51 = vadd.f32 %v1231_v54, %v1228_v55  ;;  %vm866_vm8 = vcmp.lt.s32.totalorder %v2305_v8, 0  ;;  %vm865_vm9 = vcmp.le.f32.partialorder %v864_v59, 0.7853982 }
 0x1a1   : > { %v1600_v24 = vadd.f32 %v1599_v39, %v1599_v39  ;;  %v1603_v17 = vsub.f32 %v1601_v14, %v1602_v19  ;;  %v1598_v52 = vsub.f32 %v2156_v20, %v1597_v43  ;;  %vm1007_vm1 = vweird.f32 %v2305_v8 }
 0x1a2   : > { %v2565_v33 = vshrl.u32 %v963_v44, 30  ;;  %v1236_v25 = vadd.f32 %v1235_v4, %v1232_v51 }
 0x1a3   : > { %v1606_v37 = vmul.f32 %v1600_v24, %v1596_v5  ;;  %v1607_v10 = vmul.f32 %v1603_v17, %v1442_v18  ;;  %v1609_v40 = vmul.f32 %v1603_v17, %v1596_v5  ;;  %v1610_v22 = vmul.f32 %v1600_v24, %v1442_v18 }
 0x1a4   : > { %v965_v36 = vshll.u32 %v2565_v33, 30  ;;  %v1604_v57 = vmul.f32 0.00062413706, %v1600_v24  ;;  %v1240_v42 = vadd.f32 %v1239_v48, %v1236_v25 }
 0x1a5   : > { %v1608_v11 = vadd.f32 %v1607_v10, %v1606_v37  ;;  %v1611_v13 = vsub.f32 %v1609_v40, %v1610_v22  ;;  %v988_v10 = vsub.s32 4, %v2565_v33 }
 0x1a6   : > { %v966_v3 = vsub.s32 %v962_v0, %v965_v36  ;;  %v1605_v26 = vadd.f32 %v1604_v57, %v1598_v52  ;;  %v1800_v36 = vld [vmem:[%s2186_s14 + $0x40] sm:$0xf] }
 0x1a7   : > { %v1614_v46 = vmul.f32 %v1608_v11, %v1596_v5  ;;  %v1618_v21 = vmul.f32 %v1608_v11, %v1442_v18  ;;  %v1615_v49 = vmul.f32 %v1611_v13, %v1442_v18  ;;  %v1617_v53 = vmul.f32 %v1611_v13, %v1596_v5 }
 0x1a8   : > { %vm967_vm6 = vcmp.lt.s32.totalorder %v966_v3, 0  ;;  %v968_v35 = vsub.s32 0, %v966_v3  ;;  %v1612_v47 = vmul.f32 -0.00041609135, %v1608_v11  ;;  %v989_v43 = vsel %vm866_vm8, %v988_v10, %v2565_v33  ;;  %v1801_v11 = vld [vmem:[%s2186_s14 + $0x44] sm:$0xf] }
 0x1a9   : > { %v1616_v16 = vadd.f32 %v1615_v49, %v1614_v46  ;;  %v1619_v31 = vsub.f32 %v1617_v53, %v1618_v21  ;;  %v784_v46 = vmul.f32 %v1800_v36, %v2164_v27  ;;  %v787_v21 = vmul.f32 %v1801_v11, %v2166_v28  ;;  %v1807_v36 = vld [vmem:[%s2186_s14 + $0x64] sm:$0xf] }
 0x1aa   : > { %v969_v62 = vsel %vm967_vm6, %v968_v35, %v966_v3  ;;  %v1613_v45 = vadd.f32 %v1612_v47, %v1605_v26  ;;  %v791_v33 = vmul.f32 %v1802_v61, %v2245_v29 }
 0x1ab   : > { %v970_v7 = vclz %v969_v62  ;;  %v1620_v12 = vmul.f32 0.00031206853, %v1616_v16  ;;  %v1622_v58 = vmul.f32 %v1616_v16, %v1596_v5  ;;  %v1623_v34 = vmul.f32 %v1619_v31, %v1442_v18  ;;  %v1803_v16 = vld [vmem:[%s2186_s14 + $0x50] sm:$0xf] }
 0x1ac   : > { %v788_v47 = vadd.f32 %v787_v21, %v784_v46  ;;  %v795_v28 = vmul.f32 %v1803_v16, %v2248_v30  ;;  %v1805_v30 = vld [vmem:[%s2186_s14 + $0x58] sm:$0xf] }
 0x1ad   : > { %v1814_v56 = vadd.s32 4294967294, %v970_v7  ;;  %v1624_v2 = vadd.f32 %v1623_v34, %v1622_v58  ;;  %v1621_v1 = vadd.f32 %v1620_v12, %v1613_v45  ;;  %v1804_v12 = vld [vmem:[%s2186_s14 + $0x54] sm:$0xf] }
 0x1ae   : > { %v792_v27 = vadd.f32 %v791_v33, %v788_v47 }
 0x1af   : > { %vm1815_vm7 = vcmp.lt.s32.totalorder %v1814_v56, 0  ;;  %v1625_v20 = vmul.f32 -0.0002496548, %v1624_v2 }
 0x1b0   : > { %v973_v41 = vsel %vm1815_vm7, 0, %v1814_v56  ;;  %v796_v29 = vadd.f32 %v795_v28, %v792_v27 }
 0x1b1   : > { %v974_v0 = vsub.s32 32, %v973_v41  ;;  %v978_v39 = vsub.s32 4294967266, %v973_v41  ;;  %v1626_v14 = vadd.f32 %v1625_v20, %v1621_v1  ;;  %v975_v19 = vshll.u32 %v966_v3, %v973_v41 }
 0x1b2   : > { %v991_v3 = vsel %vm865_vm9, 0, %v989_v43 }
 0x1b3   : > { %v976_v38 = vshrl.u32 %v2545_v23, %v974_v0  ;;  %v979_v44 = vadd.s32 127, %v978_v39  ;;  %v1627_v24 = vadd.f32 %v1626_v14, %v1240_v42  ;;  %v1008_v53 = vadd.s32 3, %v991_v3 }
 0x1b4   : > { %v1163_v48 = vand.u32 3, %v991_v3  ;;  %v799_v42 = vmul.f32 %v1804_v12, %v2308_v9 }
 0x1b5   : > { %v977_v5 = vor.u32 %v976_v38, %v975_v19  ;;  %v980_v18 = vshll.u32 %v979_v44, 23  ;;  %1839 = vst.msk [vmem:[%s2541_s17 + $0x8] sm:$0xf] %vm780_vm13, %v1627_v24  ;;  %v1009_v25 = vand.u32 3, %v1008_v53 }
 0x1b6   : > { %vm1168_vm11 = vcmp.eq.s32.totalorder %v1163_v48, 2  ;;  %vm1165_vm14 = vcmp.eq.s32.totalorder %v1163_v48, 0  ;;  %vm1164_vm0 = vcmp.lt.s32.totalorder %v1163_v48, 2  ;;  %v800_v9 = vadd.f32 %v799_v42, %v796_v29 }
 0x1b7   : > { %v981_v17 = vor.u32 4788187, %v980_v18  ;;  %v984_v54 = vcvt.s32.f32 %v977_v5  ;;  %vm1014_vm10 = vcmp.eq.s32.totalorder %v1009_v25, 2  ;;  %vm1011_vm12 = vcmp.eq.s32.totalorder %v1009_v25, 0  ;;  %v1806_v18 = vld [vmem:[%s2186_s14 + $0x60] sm:$0xf] }
 0x1b8   : > { %vm1010_vm15 = vcmp.lt.s32.totalorder %v1009_v25, 2  ;;  %v803_v5 = vmul.f32 %v1805_v30, %v2311_v15 }
 0x1b9   : > { %v982_v55 = vand.u32 2147483647, %v981_v17 }
 0x1bb   : > { %v985_v32 = vmul.f32 %v984_v54, %v982_v55 }
 0x1bd   : > { %v986_v37 = vxor.u32 2147483648, %v985_v32 }
 0x1bf   : > { %v987_v23 = vsel %vm866_vm8, %v986_v37, %v985_v32 }
 0x1c0   : > { %v990_v40 = vsel %vm865_vm9, %v2305_v8, %v987_v23  ;;  %v804_v23 = vadd.f32 %v803_v5, %v800_v9 }
 0x1c1   : > { %v992_v22 = vmul.f32 %v990_v40, %v990_v40 }
 0x1c3   : > { %v993_v4 = vmul.f32 -0.001358992, %v992_v22  ;;  %v1000_v13 = vmul.f32 -0.00019511016, %v992_v22 }
 0x1c5   : > { %v994_v51 = vadd.f32 0.041655596, %v993_v4  ;;  %v1001_v57 = vadd.f32 0.008332121, %v1000_v13 }
 0x1c7   : > { %v995_v59 = vmul.f32 %v994_v51, %v992_v22  ;;  %v1002_v49 = vmul.f32 %v1001_v57, %v992_v22  ;;  %v1808_v57 = vld [vmem:[%s2186_s14 + $0x68] sm:$0xf]  ;;  %s1646_s14 = sshll.u32 %s1643_s29, 4  ;;  %s1647_s14 = int_to_ptr.hbm [resolvable:$true] %s1646_s14 }
 0x1c8   : > { %s1951_s9 = sshra.s32 %s1647_s14, 4  ;;  %s1952_s9 = int_to_ptr.hbm [resolvable:$true] %s1951_s9 }
 0x1c9   : > { %v996_v35 = vadd.f32 -0.4999988, %v995_v59  ;;  %v1003_v52 = vadd.f32 -0.16666654, %v1002_v49  ;;  %s1953_s10 = scalar_lea.hbm %s1952_s9, 12  ;;  %p1958_p5 = scmp.lt.s32.totalorder %s1952_s9, %s2649_s5 }
 0x1ca   : > { %p1954_p1 = scmp.ne.s32.totalorder %s1952_s9, %s1953_s10  ;;  %p1959_p6 = scmp.lt.s32.totalorder %s1957_s13, %s1953_s10 }
 0x1cb   : > { %v997_v31 = vmul.f32 %v996_v35, %v992_v22  ;;  %v1004_v62 = vmul.f32 %v1003_v52, %v992_v22 }
 0x1cc   : > { %p1955_p2 = pnand %p1954_p1, %p2101_p4  ;;  %p1960_p7 = por %p1959_p6, %p1958_p5 }
 0x1cd   : > { %v998_v7 = vadd.f32 1.0, %v997_v31  ;;  %v1005_v26 = vadd.f32 1.0, %v1004_v62 }
 0x1ce   : > { %p1956_p3 = pneg %p1955_p2 }
 0x1cf   : > { %v1006_v58 = vmul.f32 %v1005_v26, %v990_v40  ;;  %v1015_v34 = vxor.u32 2147483648, %v998_v7  ;;  %v807_v40 = vmul.f32 %v1806_v18, %v2323_v50  ;;  %v815_v50 = vmul.f32 %v1808_v57, %v2430_v6 }
 0x1d0   : > { %p1961_p9 = pnand %p1960_p7, %p1956_p3 }
 0x1d1   : > { %v1012_v56 = vxor.u32 2147483648, %v1006_v58  ;;  %v1016_v45 = vsel %vm1014_vm10, %v1015_v34, %v1006_v58  ;;  %v1170_v2 = vsel %vm1168_vm11, %v1015_v34, %v1006_v58  ;;  %v808_v51 = vadd.f32 %v807_v40, %v804_v23 }
 0x1d3   : > { %v1013_v1 = vsel %vm1011_vm12, %v998_v7, %v1012_v56  ;;  %v1167_v20 = vsel %vm1165_vm14, %v998_v7, %v1012_v56 }
 0x1d4   : > { %v1017_v41 = vsel %vm1010_vm15, %v1013_v1, %v1016_v45  ;;  %v1171_v0 = vsel %vm1164_vm0, %v1167_v20, %v1170_v2 }
 0x1d5   : > { %v1018_v39 = vsel %vm1007_vm1, nan, %v1017_v41  ;;  %v1172_v14 = vsel %vm1007_vm1, nan, %v1171_v0 }
 0x1d6   : > { %v1173_v19 = vmul.f32 0.0012482741, %v1018_v39  ;;  %v1175_v38 = vmul.f32 %v1172_v14, %v1018_v39  ;;  %v1177_v44 = vmul.f32 %v1172_v14, %v1172_v14  ;;  %v1178_v24 = vmul.f32 %v1018_v39, %v1018_v39 }
 0x1d8   : > { %v1176_v17 = vadd.f32 %v1175_v38, %v1175_v38  ;;  %v1179_v55 = vsub.f32 %v1177_v44, %v1178_v24  ;;  %v1174_v54 = vsub.f32 %v2292_v60, %v1173_v19  ;;  %v811_v60 = vmul.f32 %v1807_v36, %v2363_v63 }
 0x1da   : > { %v1180_v32 = vmul.f32 0.00062413706, %v1176_v17  ;;  %v1182_v8 = vmul.f32 %v1176_v17, %v1172_v14  ;;  %v1183_v37 = vmul.f32 %v1179_v55, %v1018_v39  ;;  %v1185_v10 = vmul.f32 %v1179_v55, %v1172_v14 }
 0x1db   : > { %v1186_v22 = vmul.f32 %v1176_v17, %v1018_v39  ;;  %v812_v53 = vadd.f32 %v811_v60, %v808_v51 }
 0x1dc   : > { %v1181_v43 = vadd.f32 %v1180_v32, %v1174_v54  ;;  %v1184_v11 = vadd.f32 %v1183_v37, %v1182_v8 }
 0x1dd   : > { %v1187_v4 = vsub.f32 %v1185_v10, %v1186_v22  ;;  %v816_v16 = vadd.f32 %v815_v50, %v812_v53 }
 0x1de   : > { %v1188_v15 = vmul.f32 -0.00041609135, %v1184_v11  ;;  %v1190_v13 = vmul.f32 %v1184_v11, %v1172_v14  ;;  %v1194_v3 = vmul.f32 %v1184_v11, %v1018_v39 }
 0x1df   : > { %v1191_v46 = vmul.f32 %v1187_v4, %v1018_v39  ;;  %v1193_v21 = vmul.f32 %v1187_v4, %v1172_v14 }
 0x1e0   : > { %v1189_v61 = vadd.f32 %v1188_v15, %v1181_v43 }
 0x1e1   : > { %v1192_v59 = vadd.f32 %v1191_v46, %v1190_v13  ;;  %v1195_v49 = vsub.f32 %v1193_v21, %v1194_v3 }
 0x1e3   : > { %v1196_v35 = vmul.f32 0.00031206853, %v1192_v59  ;;  %v1198_v52 = vmul.f32 %v1192_v59, %v1172_v14  ;;  %v1199_v47 = vmul.f32 %v1195_v49, %v1018_v39 }
 0x1e5   : > { %v1197_v63 = vadd.f32 %v1196_v35, %v1189_v61  ;;  %v1200_v33 = vadd.f32 %v1199_v47, %v1198_v52 }
 0x1e7   : > { %v1201_v31 = vmul.f32 -0.0002496548, %v1200_v33 }
 0x1e9   : > { %v1202_v62 = vadd.f32 %v1201_v31, %v1197_v63 }
 0x1eb   : > { %v1203_v6 = vadd.f32 %v1202_v62, %v816_v16 }
 0x1ed   : > { %1819 = vst.msk [vmem:[%s2541_s17 + $0x4] sm:$0xf] %vm780_vm13, %v1203_v6 }
 0x1ee   : > { %1964 = shalt.err (!%p1961_p9)
}
 0x1ef   : > { %s2029_s15 = smov 64   ;;  %s2030_s17 = smov 4  }
 0x1f0   : > { %1851 = dma.vmem_to_hbm [thread:$0]  (%p2101_p4), %s1645_s21, 192, %s1647_s14, %s1631_s8, %s2029_s15, %s2029_s15, %s2030_s17  }
 0x1f1 PF: > { %p1863_p10 = scmp.ge.s32.totalorder %s2019_s23, 2  ;;  %s1661_s24 = sand.u32 1, %s1999_s18  }
 0x1f2   : > { %s1662_s25 = scalar_lea.sflag [#allocation3], %s1661_s24 }
 0x1f3   : > { %p1858_p11 = pnand %p1863_p10, %p2108_p8 }
 0x1f5   : > { %p1859_p12 = pneg %p1858_p11 }
 0x1f7   : > { %1994 = dma.done.wait (%p1859_p12), %s1662_s25, 192  }
 0x1f8   : > { %1996 = vsyncadd (%p1859_p12), %s1662_s25, 4294967104  ;;  %s19_s23 = sadd.s32 1, %s2019_s23   ;;  %s2656_s18 = smov %s2003_s19 }
 0x1f9   : > { %p16_p13 = scmp.ge.s32.totalorder %s19_s23, 4   ;;  %s2657_s19 = smov %s2007_s20 }
 0x1fa   : > { %s2658_s20 = smov %s2114_s6  ;;  %s2659_s21 = smov %s2015_s22 }
 0x1fb   : > { %s2660_s22 = smov %s2662_s26  ;;  %18 = sbr.rel (!%p16_p13) target bundleno = 5 (0x5), region = 116 }
 0x200   :  { %1668 = vsyncpa [#allocation3], 1 }
 0x201   :  { %1670 = vsyncpa [#allocation3 + $0x1], 1 }
 0x202   :  { %1671 = vsyncpa [#allocation4], 1 }
 0x203   :  { %1673 = vsyncpa [#allocation4 + $0x1], 1 }

</bundles_post_ra>
